<compile_context>
chip_gen: v7x
topology: tpu7x:2x2x1
jax: 0.10.0
libtpu: 0.0.40
codegen_flags: <defaults>
</compile_context>

<pallas_src>
import functools
import math

import jax
import jax.numpy as jnp
from jax.experimental import pallas as pl
from jax.experimental.pallas import tpu as pltpu


def _encoder_kernel(n_heads, key_dim, val_dim, eps,
                    x_ref, wi_ref, bi_ref,
                    wq_ref, wk_ref, wv_ref, wo_ref,
                    g1_ref, bt1_ref,
                    w1_ref, b1_ref, w2_ref, b2_ref,
                    g2_ref, bt2_ref,
                    hout_ref, hmean_ref):
    l = pl.program_id(0)
    n_layers = pl.num_programs(0)
    B, N, H = hout_ref.shape
    BN = B * N

    # ---- initial linear embedding (first grid step only) --------------------
    # hout_ref doubles as the residual-stream carrier: its block index is
    # constant across the layer axis, so the block stays resident in VMEM and
    # is written back to HBM only once after the last layer.
    @pl.when(l == 0)
    def _():
        x = x_ref[...].reshape(BN, -1).astype(jnp.bfloat16)
        h0 = jnp.dot(x, wi_ref[...],
                     preferred_element_type=jnp.float32) + bi_ref[...]
        hout_ref[...] = h0.reshape(B, N, H)

    hf = hout_ref[...].reshape(BN, H)            # residual stream (f32)
    hb = hf.astype(jnp.bfloat16)

    # ---- fused multi-head self-attention ------------------------------------
    # Q/K/V for all heads in three lane-dense bf16 matmuls; the 1/sqrt(key_dim)
    # attention scale is folded into wq at parameter-pack time.
    q = jnp.dot(hb, wq_ref[0], preferred_element_type=jnp.float32)   # (BN, heads*K)
    k = jnp.dot(hb, wk_ref[0], preferred_element_type=jnp.float32)   # (BN, heads*K)
    v = jnp.dot(hb, wv_ref[0], preferred_element_type=jnp.float32)   # (BN, heads*V)

    # Attention core per head via static lane slices of the fused Q/K/V.
    # TODO(synk): a single head-batched einsum ('bhnk,bhmk->bhnm') would need a
    # rank-4 head-major relayout that Mosaic lowers poorly at these shapes; the
    # per-head loop keeps everything on supported 3-D batched dots (the fused
    # projections / output matmul already carry the dominant MXU win).
    ctx_heads = []
    for a in range(n_heads):                      # static unroll (light body)
        qa = q[:, a * key_dim:(a + 1) * key_dim].reshape(B, N, key_dim)
        ka = k[:, a * key_dim:(a + 1) * key_dim].reshape(B, N, key_dim)
        va = v[:, a * val_dim:(a + 1) * val_dim].reshape(B, N, val_dim)
        s = jnp.einsum('bnk,bmk->bnm', qa, ka,
                       preferred_element_type=jnp.float32)           # (B, N, N)
        s = s - jnp.max(s, axis=-1, keepdims=True)
        p = jnp.exp(s)
        p = p * pl.reciprocal(jnp.sum(p, axis=-1, keepdims=True), approx=True)
        ha = jnp.einsum('bnm,bmv->bnv', p, va,
                        preferred_element_type=jnp.float32)          # (B, N, V)
        ctx_heads.append(ha.reshape(BN, val_dim))
    ctx = jnp.concatenate(ctx_heads, axis=-1)     # (BN, heads*V), lane-dense
    mha = jnp.dot(ctx.astype(jnp.bfloat16), wo_ref[0],
                  preferred_element_type=jnp.float32)                # one fused proj

    # ---- skip connection + BatchNorm1d (train-mode batch stats over B*N) ----
    h1 = hf + mha
    mu1 = jnp.mean(h1, axis=0, keepdims=True)
    var1 = jnp.mean((h1 - mu1) ** 2, axis=0, keepdims=True)
    h1n = (h1 - mu1) * jax.lax.rsqrt(var1 + eps) * g1_ref[0] + bt1_ref[0]

    # ---- feed forward + skip + BatchNorm1d -----------------------------------
    ff = jnp.dot(h1n.astype(jnp.bfloat16), w1_ref[0],
                 preferred_element_type=jnp.float32) + b1_ref[0]
    ff = jnp.maximum(ff, 0.0)
    ff = jnp.dot(ff.astype(jnp.bfloat16), w2_ref[0],
                 preferred_element_type=jnp.float32) + b2_ref[0]
    h2 = h1n + ff
    mu2 = jnp.mean(h2, axis=0, keepdims=True)
    var2 = jnp.mean((h2 - mu2) ** 2, axis=0, keepdims=True)
    h2n = ((h2 - mu2) * jax.lax.rsqrt(var2 + eps) * g2_ref[0]
           + bt2_ref[0]).reshape(B, N, H)

    hout_ref[...] = h2n                           # carry residual to next layer

    # Graph embedding (mean over nodes) only on the final layer.
    @pl.when(l == n_layers - 1)
    def _():
        hmean_ref[...] = jnp.mean(h2n, axis=1)


def user_encoder_forward(x, params, *, n_heads, eps=1e-5):
    """Runs the transformer-style UserEncoder. Returns (node_emb, graph_emb).

    `params` must be in the fused/packed layout produced by `pack_params`.
    """
    B, N, Din = x.shape
    H = params['w_init'].shape[1]
    L, _, HK = params['wq'].shape
    HV = params['wv'].shape[-1]
    FF = params['w1'].shape[-1]
    K = HK // n_heads
    V = HV // n_heads

    kernel = functools.partial(_encoder_kernel, n_heads, K, V, eps)

    fixed2 = lambda l: (0, 0)
    fixed3 = lambda l: (0, 0, 0)
    layer3 = lambda l: (l, 0, 0)

    in_specs = [
        pl.BlockSpec((B, N, Din), fixed3),      # x
        pl.BlockSpec((Din, H), fixed2),         # w_init (bf16)
        pl.BlockSpec((1, H), fixed2),           # b_init
        pl.BlockSpec((1, H, HK), layer3),       # wq fused (scale folded, bf16)
        pl.BlockSpec((1, H, HK), layer3),       # wk fused (bf16)
        pl.BlockSpec((1, H, HV), layer3),       # wv fused (bf16)
        pl.BlockSpec((1, HV, H), layer3),       # wo fused (bf16)
        pl.BlockSpec((1, 1, H), layer3),        # bn1 gamma
        pl.BlockSpec((1, 1, H), layer3),        # bn1 beta
        pl.BlockSpec((1, H, FF), layer3),       # ff w1 (bf16)
        pl.BlockSpec((1, 1, FF), layer3),       # ff b1
        pl.BlockSpec((1, FF, H), layer3),       # ff w2 (bf16)
        pl.BlockSpec((1, 1, H), layer3),        # ff b2
        pl.BlockSpec((1, 1, H), layer3),        # bn2 gamma
        pl.BlockSpec((1, 1, H), layer3),        # bn2 beta
    ]
    out_specs = [
        pl.BlockSpec((B, N, H), fixed3),        # node embeddings (residual carrier)
        pl.BlockSpec((B, H), fixed2),           # graph embedding (mean over N)
    ]
    out_shape = (jax.ShapeDtypeStruct((B, N, H), jnp.float32),
                 jax.ShapeDtypeStruct((B, H), jnp.float32))

    # TODO(synk): on v7x the layer axis is inherently sequential and BatchNorm
    # couples the whole batch, so the second TensorCore is unused here; at
    # production sizes attention should also be re-tiled flash-style.
    return pl.pallas_call(
        kernel,
        out_shape=out_shape,
        grid_spec=pltpu.PrefetchScalarGridSpec(
            num_scalar_prefetch=0,
            grid=(L,),
            in_specs=in_specs,
            out_specs=out_specs),
        compiler_params=pltpu.CompilerParams(
            dimension_semantics=("arbitrary",)),
    )(x, params['w_init'], params['b_init'],
      params['wq'], params['wk'], params['wv'], params['wo'],
      params['bn1_g'], params['bn1_b'],
      params['w1'], params['b1'], params['w2'], params['b2'],
      params['bn2_g'], params['bn2_b'])


def init_params(key, input_dim, hidden_dim, n_heads, n_layers, ff_hidden):
    """Per-head parameters mirroring the PyTorch GraphAttentionEncoder layout."""
    K = hidden_dim // n_heads
    V = hidden_dim // n_heads
    ks = jax.random.split(key, 10)

    def u(k, shape, fan):
        bound = 1.0 / math.sqrt(fan)
        return jax.random.uniform(k, shape, jnp.float32, -bound, bound)

    return dict(
        w_init=u(ks[0], (input_dim, hidden_dim), input_dim),
        b_init=u(ks[1], (1, hidden_dim), input_dim),
        wq=u(ks[2], (n_layers, n_heads, hidden_dim, K), K),
        wk=u(ks[3], (n_layers, n_heads, hidden_dim, K), K),
        wv=u(ks[4], (n_layers, n_heads, hidden_dim, V), V),
        wo=u(ks[5], (n_layers, n_heads, V, hidden_dim), hidden_dim),
        bn1_g=jnp.ones((n_layers, 1, hidden_dim), jnp.float32),
        bn1_b=jnp.zeros((n_layers, 1, hidden_dim), jnp.float32),
        w1=u(ks[6], (n_layers, hidden_dim, ff_hidden), hidden_dim),
        b1=u(ks[7], (n_layers, 1, ff_hidden), hidden_dim),
        w2=u(ks[8], (n_layers, ff_hidden, hidden_dim), ff_hidden),
        b2=u(ks[9], (n_layers, 1, hidden_dim), ff_hidden),
        bn2_g=jnp.ones((n_layers, 1, hidden_dim), jnp.float32),
        bn2_b=jnp.zeros((n_layers, 1, hidden_dim), jnp.float32),
    )


def pack_params(p, n_heads):
    """Repack per-head params into the fused, lane-dense layout the kernel uses.

    Heads are stacked along the last (lane) axis for Q/K/V, per-head output
    weights are stacked along rows for one fused output matmul, the attention
    scale 1/sqrt(K) is folded into wq, and matmul weights are cast to bf16.
    """
    L, nh, H, K = p['wq'].shape
    V = p['wv'].shape[-1]
    scale = 1.0 / math.sqrt(K)
    bf = lambda a: a.astype(jnp.bfloat16)
    return dict(
        w_init=bf(p['w_init']),
        b_init=p['b_init'],
        wq=bf((p['wq'] * scale).transpose(0, 2, 1, 3).reshape(L, H, nh * K)),
        wk=bf(p['wk'].transpose(0, 2, 1, 3).reshape(L, H, nh * K)),
        wv=bf(p['wv'].transpose(0, 2, 1, 3).reshape(L, H, nh * V)),
        wo=bf(p['wo'].reshape(L, nh * V, H)),
        bn1_g=p['bn1_g'], bn1_b=p['bn1_b'],
        w1=bf(p['w1']), b1=p['b1'],
        w2=bf(p['w2']), b2=p['b2'],
        bn2_g=p['bn2_g'], bn2_b=p['bn2_b'],
    )


def reference_forward(x, params, *, n_heads, eps=1e-5):
    """Pure-JAX mirror of the PyTorch GraphAttentionEncoder forward
    (train-mode BatchNorm), evaluated with the same packed weights and the
    same bf16-matmul / f32-accumulation precision as the kernel (with float32
    weights and exact division it is exactly the PyTorch float32 forward)."""
    B, N, Din = x.shape
    H = params['w_init'].shape[1]
    L, _, HK = params['wq'].shape
    HV = params['wv'].shape[-1]
    K = HK // n_heads
    V = HV // n_heads

    def mm(a, b):
        return jnp.dot(a.astype(jnp.bfloat16), b.astype(jnp.bfloat16),
                       preferred_element_type=jnp.float32)

    def bn(z, g, b):
        mu = jnp.mean(z, axis=0, keepdims=True)
        var = jnp.mean((z - mu) ** 2, axis=0, keepdims=True)
        return (z - mu) / jnp.sqrt(var + eps) * g + b

    h = (mm(x.reshape(-1, Din), params['w_init'])
         + params['b_init']).reshape(B, N, H)
    for l in range(L):
        hf = h.reshape(-1, H)
        q = mm(hf, params['wq'][l]).reshape(B, N, n_heads, K)
        k = mm(hf, params['wk'][l]).reshape(B, N, n_heads, K)
        v = mm(hf, params['wv'][l]).reshape(B, N, n_heads, V)
        s = jnp.einsum('bnhk,bmhk->bhnm', q, k)     # 1/sqrt(K) folded into wq
        p = jax.nn.softmax(s, axis=-1)
        ctx = jnp.einsum('bhnm,bmhv->bnhv', p, v).reshape(-1, HV)
        mha = mm(ctx, params['wo'][l])
        h1n = bn(hf + mha, params['bn1_g'][l], params['bn1_b'][l])
        ff = jnp.maximum(mm(h1n, params['w1'][l]) + params['b1'][l], 0.0)
        ff = mm(ff, params['w2'][l]) + params['b2'][l]
        h = bn(h1n + ff, params['bn2_g'][l], params['bn2_b'][l]).reshape(B, N, H)
    return h, jnp.mean(h, axis=1)


if __name__ == "__main__":
    # Small, module-consistent shapes.
    B, N = 2, 8                 # batch, number of "user" nodes (sequence)
    input_dim = 16
    hidden_dim = 32
    n_heads = 8
    n_layers = 2
    ff_hidden = 64

    key = jax.random.PRNGKey(0)
    kx, kp = jax.random.split(key)
    x = jax.random.normal(kx, (B, N, input_dim), dtype=jnp.float32)
    raw_params = init_params(kp, input_dim, hidden_dim, n_heads, n_layers, ff_hidden)
    params = pack_params(raw_params, n_heads)

    node_emb, graph_emb = user_encoder_forward(x, params, n_heads=n_heads)
    node_emb = jax.block_until_ready(node_emb)
    graph_emb = jax.block_until_ready(graph_emb)

    ref_node, ref_graph = reference_forward(x, params, n_heads=n_heads)
    # Tolerance covers the approx softmax reciprocal and MXU accumulation order.
    assert jnp.allclose(node_emb, ref_node, atol=2e-2, rtol=2e-2), "node emb mismatch"
    assert jnp.allclose(graph_emb, ref_graph, atol=2e-2, rtol=2e-2), "graph emb mismatch"

    # TODO(synk): the 'lstm' embedding_type (sequential recurrence) and BatchNorm
    # running-statistics buffer updates are not modeled in this kernel.
    print("KERNEL_OK")
</pallas_src>

<mosaic_0001>
module attributes {stable_mosaic.version = 11 : i64} {
  func.func @_encoder_kernel(%arg0: i32, %arg1: memref<2x8x16xf32, #tpu.memory_space<vmem>>, %arg2: memref<16x32xbf16, #tpu.memory_space<vmem>>, %arg3: memref<1x32xf32, #tpu.memory_space<vmem>>, %arg4: memref<1x32x32xbf16, #tpu.memory_space<vmem>>, %arg5: memref<1x32x32xbf16, #tpu.memory_space<vmem>>, %arg6: memref<1x32x32xbf16, #tpu.memory_space<vmem>>, %arg7: memref<1x32x32xbf16, #tpu.memory_space<vmem>>, %arg8: memref<1x1x32xf32, #tpu.memory_space<vmem>>, %arg9: memref<1x1x32xf32, #tpu.memory_space<vmem>>, %arg10: memref<1x32x64xbf16, #tpu.memory_space<vmem>>, %arg11: memref<1x1x64xf32, #tpu.memory_space<vmem>>, %arg12: memref<1x64x32xbf16, #tpu.memory_space<vmem>>, %arg13: memref<1x1x32xf32, #tpu.memory_space<vmem>>, %arg14: memref<1x1x32xf32, #tpu.memory_space<vmem>>, %arg15: memref<1x1x32xf32, #tpu.memory_space<vmem>>, %arg16: memref<2x8x32xf32, #tpu.memory_space<vmem>>, %arg17: memref<2x32xf32, #tpu.memory_space<vmem>>) attributes {dimension_semantics = [#tpu.dimension_semantics<arbitrary>], iteration_bounds = array<i64: 2>, scalar_prefetch = 0 : i64, scratch_operands = 0 : i64, tpu.core_type = #tpu.core_type<tc>, window_params = [{pipeline_mode = #tpu.pipeline_mode<synchronous>, transform_indices = @transform_0, window_bounds = array<i64: 2, 8, 16>}, {pipeline_mode = #tpu.pipeline_mode<synchronous>, transform_indices = @transform_1, window_bounds = array<i64: 16, 32>}, {pipeline_mode = #tpu.pipeline_mode<synchronous>, transform_indices = @transform_2, window_bounds = array<i64: 1, 32>}, {transform_indices = @transform_3, window_bounds = array<i64: 1, 32, 32>}, {transform_indices = @transform_4, window_bounds = array<i64: 1, 32, 32>}, {transform_indices = @transform_5, window_bounds = array<i64: 1, 32, 32>}, {transform_indices = @transform_6, window_bounds = array<i64: 1, 32, 32>}, {transform_indices = @transform_7, window_bounds = array<i64: 1, 1, 32>}, {transform_indices = @transform_8, window_bounds = array<i64: 1, 1, 32>}, {transform_indices = @transform_9, window_bounds = array<i64: 1, 32, 64>}, {transform_indices = @transform_10, window_bounds = array<i64: 1, 1, 64>}, {transform_indices = @transform_11, window_bounds = array<i64: 1, 64, 32>}, {transform_indices = @transform_12, window_bounds = array<i64: 1, 1, 32>}, {transform_indices = @transform_13, window_bounds = array<i64: 1, 1, 32>}, {transform_indices = @transform_14, window_bounds = array<i64: 1, 1, 32>}, {pipeline_mode = #tpu.pipeline_mode<synchronous>, transform_indices = @transform_15, window_bounds = array<i64: 2, 8, 32>}, {pipeline_mode = #tpu.pipeline_mode<synchronous>, transform_indices = @transform_16, window_bounds = array<i64: 2, 32>}]} {
    %c0_i32 = arith.constant 0 : i32
    %0 = arith.cmpi eq, %arg0, %c0_i32 : i32
    %1 = arith.extui %0 : i1 to i32
    %c0_i32_0 = arith.constant 0 : i32
    %2 = arith.cmpi ne, %1, %c0_i32_0 : i32
    scf.if %2 {
      %c0_91 = arith.constant 0 : index
      %c0_92 = arith.constant 0 : index
      %c0_93 = arith.constant 0 : index
      %249 = vector.load %arg1[%c0_91, %c0_92, %c0_93] : memref<2x8x16xf32, #tpu.memory_space<vmem>>, vector<2x8x16xf32>
      %250 = vector.shape_cast %249 : vector<2x8x16xf32> to vector<16x16xf32>
      %251 = arith.truncf %250 : vector<16x16xf32> to vector<16x16xbf16>
      %c0_94 = arith.constant 0 : index
      %c0_95 = arith.constant 0 : index
      %252 = vector.load %arg2[%c0_94, %c0_95] : memref<16x32xbf16, #tpu.memory_space<vmem>>, vector<16x32xbf16>
      %cst_96 = arith.constant dense<0.000000e+00> : vector<16x32xf32>
      %253 = tpu.matmul %251, %252, %cst_96 {dimension_numbers = #tpu.dot_dimension_numbers<[1], [0], [0], [1], [0, 0, 1, 1], [], []>} : vector<16x16xbf16>, vector<16x32xbf16>, vector<16x32xf32> -> vector<16x32xf32>
      %c0_97 = arith.constant 0 : index
      %c0_98 = arith.constant 0 : index
      %254 = vector.load %arg3[%c0_97, %c0_98] : memref<1x32xf32, #tpu.memory_space<vmem>>, vector<1x32xf32>
      %255 = vector.broadcast %254 : vector<1x32xf32> to vector<16x32xf32>
      %256 = arith.addf %253, %255 : vector<16x32xf32>
      %257 = vector.shape_cast %256 : vector<16x32xf32> to vector<2x8x32xf32>
      %c0_99 = arith.constant 0 : index
      %c0_100 = arith.constant 0 : index
      %c0_101 = arith.constant 0 : index
      %258 = vector.load %arg16[%c0_99, %c0_100, %c0_101] : memref<2x8x32xf32, #tpu.memory_space<vmem>>, vector<2x8x32xf32>
      tpu.vector_store %arg16[%c0_99, %c0_100, %c0_101], %257 {strides = array<i32>} : memref<2x8x32xf32, #tpu.memory_space<vmem>>, vector<2x8x32xf32>,
    } else {
    }
    %c0 = arith.constant 0 : index
    %c0_1 = arith.constant 0 : index
    %c0_2 = arith.constant 0 : index
    %3 = vector.load %arg16[%c0, %c0_1, %c0_2] : memref<2x8x32xf32, #tpu.memory_space<vmem>>, vector<2x8x32xf32>
    %4 = vector.shape_cast %3 : vector<2x8x32xf32> to vector<16x32xf32>
    %5 = arith.truncf %4 : vector<16x32xf32> to vector<16x32xbf16>
    %c0_3 = arith.constant 0 : index
    %c0_4 = arith.constant 0 : index
    %c0_5 = arith.constant 0 : index
    %6 = vector.load %arg4[%c0_3, %c0_4, %c0_5] : memref<1x32x32xbf16, #tpu.memory_space<vmem>>, vector<1x32x32xbf16>
    %7 = vector.shape_cast %6 : vector<1x32x32xbf16> to vector<32x32xbf16>
    %cst = arith.constant dense<0.000000e+00> : vector<16x32xf32>
    %8 = tpu.matmul %5, %7, %cst {dimension_numbers = #tpu.dot_dimension_numbers<[1], [0], [0], [1], [0, 0, 1, 1], [], []>} : vector<16x32xbf16>, vector<32x32xbf16>, vector<16x32xf32> -> vector<16x32xf32>
    %c0_6 = arith.constant 0 : index
    %c0_7 = arith.constant 0 : index
    %c0_8 = arith.constant 0 : index
    %9 = vector.load %arg5[%c0_6, %c0_7, %c0_8] : memref<1x32x32xbf16, #tpu.memory_space<vmem>>, vector<1x32x32xbf16>
    %10 = vector.shape_cast %9 : vector<1x32x32xbf16> to vector<32x32xbf16>
    %cst_9 = arith.constant dense<0.000000e+00> : vector<16x32xf32>
    %11 = tpu.matmul %5, %10, %cst_9 {dimension_numbers = #tpu.dot_dimension_numbers<[1], [0], [0], [1], [0, 0, 1, 1], [], []>} : vector<16x32xbf16>, vector<32x32xbf16>, vector<16x32xf32> -> vector<16x32xf32>
    %c0_10 = arith.constant 0 : index
    %c0_11 = arith.constant 0 : index
    %c0_12 = arith.constant 0 : index
    %12 = vector.load %arg6[%c0_10, %c0_11, %c0_12] : memref<1x32x32xbf16, #tpu.memory_space<vmem>>, vector<1x32x32xbf16>
    %13 = vector.shape_cast %12 : vector<1x32x32xbf16> to vector<32x32xbf16>
    %cst_13 = arith.constant dense<0.000000e+00> : vector<16x32xf32>
    %14 = tpu.matmul %5, %13, %cst_13 {dimension_numbers = #tpu.dot_dimension_numbers<[1], [0], [0], [1], [0, 0, 1, 1], [], []>} : vector<16x32xbf16>, vector<32x32xbf16>, vector<16x32xf32> -> vector<16x32xf32>
    %15 = vector.extract_strided_slice %8 {offsets = [0, 0], sizes = [16, 4], strides = [1, 1]} : vector<16x32xf32> to vector<16x4xf32>
    %16 = vector.shape_cast %15 : vector<16x4xf32> to vector<2x8x4xf32>
    %17 = vector.extract_strided_slice %11 {offsets = [0, 0], sizes = [16, 4], strides = [1, 1]} : vector<16x32xf32> to vector<16x4xf32>
    %18 = vector.shape_cast %17 : vector<16x4xf32> to vector<2x8x4xf32>
    %19 = vector.extract_strided_slice %14 {offsets = [0, 0], sizes = [16, 4], strides = [1, 1]} : vector<16x32xf32> to vector<16x4xf32>
    %20 = vector.shape_cast %19 : vector<16x4xf32> to vector<2x8x4xf32>
    "tpu.trace_start"() <{level = 10 : i32, message = "bnk,bmk->bnm"}> : () -> ()
    %cst_14 = arith.constant dense<0.000000e+00> : vector<2x8x8xf32>
    %21 = tpu.matmul %16, %18, %cst_14 {dimension_numbers = #tpu.dot_dimension_numbers<[2], [2], [1], [1], [0, 0, 0, 1, 1, 1], [0], [0]>} : vector<2x8x4xf32>, vector<2x8x4xf32>, vector<2x8x8xf32> -> vector<2x8x8xf32>
    "tpu.trace_stop"() : () -> ()
    %cst_15 = arith.constant dense<0xFF800000> : vector<2x8xf32>
    %22 = vector.multi_reduction <maximumf>, %21, %cst_15 [2] : vector<2x8x8xf32> to vector<2x8xf32>
    %23 = vector.shape_cast %22 : vector<2x8xf32> to vector<2x8x1xf32>
    %24 = vector.broadcast %23 : vector<2x8x1xf32> to vector<2x8x8xf32>
    %25 = arith.subf %21, %24 : vector<2x8x8xf32>
    %26 = math.exp %25 : vector<2x8x8xf32>
    %cst_16 = arith.constant dense<0.000000e+00> : vector<2x8xf32>
    %27 = vector.multi_reduction <add>, %26, %cst_16 [2] : vector<2x8x8xf32> to vector<2x8xf32>
    %28 = vector.shape_cast %27 : vector<2x8xf32> to vector<2x8x1xf32>
    %29 = tpu.reciprocal %28 {approx = true} : vector<2x8x1xf32> -> vector<2x8x1xf32>
    %30 = vector.broadcast %29 : vector<2x8x1xf32> to vector<2x8x8xf32>
    %31 = arith.mulf %26, %30 : vector<2x8x8xf32>
    "tpu.trace_start"() <{level = 10 : i32, message = "bnm,bmv->bnv"}> : () -> ()
    %cst_17 = arith.constant dense<0.000000e+00> : vector<2x8x4xf32>
    %32 = tpu.matmul %31, %20, %cst_17 {dimension_numbers = #tpu.dot_dimension_numbers<[2], [1], [1], [2], [0, 0, 0, 1, 1, 2], [0], [0]>} : vector<2x8x8xf32>, vector<2x8x4xf32>, vector<2x8x4xf32> -> vector<2x8x4xf32>
    "tpu.trace_stop"() : () -> ()
    %33 = vector.shape_cast %32 : vector<2x8x4xf32> to vector<16x4xf32>
    %34 = vector.extract_strided_slice %8 {offsets = [0, 4], sizes = [16, 4], strides = [1, 1]} : vector<16x32xf32> to vector<16x4xf32>
    %35 = vector.shape_cast %34 : vector<16x4xf32> to vector<2x8x4xf32>
    %36 = vector.extract_strided_slice %11 {offsets = [0, 4], sizes = [16, 4], strides = [1, 1]} : vector<16x32xf32> to vector<16x4xf32>
    %37 = vector.shape_cast %36 : vector<16x4xf32> to vector<2x8x4xf32>
    %38 = vector.extract_strided_slice %14 {offsets = [0, 4], sizes = [16, 4], strides = [1, 1]} : vector<16x32xf32> to vector<16x4xf32>
    %39 = vector.shape_cast %38 : vector<16x4xf32> to vector<2x8x4xf32>
    "tpu.trace_start"() <{level = 10 : i32, message = "bnk,bmk->bnm"}> : () -> ()
    %cst_18 = arith.constant dense<0.000000e+00> : vector<2x8x8xf32>
    %40 = tpu.matmul %35, %37, %cst_18 {dimension_numbers = #tpu.dot_dimension_numbers<[2], [2], [1], [1], [0, 0, 0, 1, 1, 1], [0], [0]>} : vector<2x8x4xf32>, vector<2x8x4xf32>, vector<2x8x8xf32> -> vector<2x8x8xf32>
    "tpu.trace_stop"() : () -> ()
    %cst_19 = arith.constant dense<0xFF800000> : vector<2x8xf32>
    %41 = vector.multi_reduction <maximumf>, %40, %cst_19 [2] : vector<2x8x8xf32> to vector<2x8xf32>
    %42 = vector.shape_cast %41 : vector<2x8xf32> to vector<2x8x1xf32>
    %43 = vector.broadcast %42 : vector<2x8x1xf32> to vector<2x8x8xf32>
    %44 = arith.subf %40, %43 : vector<2x8x8xf32>
    %45 = math.exp %44 : vector<2x8x8xf32>
    %cst_20 = arith.constant dense<0.000000e+00> : vector<2x8xf32>
    %46 = vector.multi_reduction <add>, %45, %cst_20 [2] : vector<2x8x8xf32> to vector<2x8xf32>
    %47 = vector.shape_cast %46 : vector<2x8xf32> to vector<2x8x1xf32>
    %48 = tpu.reciprocal %47 {approx = true} : vector<2x8x1xf32> -> vector<2x8x1xf32>
    %49 = vector.broadcast %48 : vector<2x8x1xf32> to vector<2x8x8xf32>
    %50 = arith.mulf %45, %49 : vector<2x8x8xf32>
    "tpu.trace_start"() <{level = 10 : i32, message = "bnm,bmv->bnv"}> : () -> ()
    %cst_21 = arith.constant dense<0.000000e+00> : vector<2x8x4xf32>
    %51 = tpu.matmul %50, %39, %cst_21 {dimension_numbers = #tpu.dot_dimension_numbers<[2], [1], [1], [2], [0, 0, 0, 1, 1, 2], [0], [0]>} : vector<2x8x8xf32>, vector<2x8x4xf32>, vector<2x8x4xf32> -> vector<2x8x4xf32>
    "tpu.trace_stop"() : () -> ()
    %52 = vector.shape_cast %51 : vector<2x8x4xf32> to vector<16x4xf32>
    %53 = vector.extract_strided_slice %8 {offsets = [0, 8], sizes = [16, 4], strides = [1, 1]} : vector<16x32xf32> to vector<16x4xf32>
    %54 = vector.shape_cast %53 : vector<16x4xf32> to vector<2x8x4xf32>
    %55 = vector.extract_strided_slice %11 {offsets = [0, 8], sizes = [16, 4], strides = [1, 1]} : vector<16x32xf32> to vector<16x4xf32>
    %56 = vector.shape_cast %55 : vector<16x4xf32> to vector<2x8x4xf32>
    %57 = vector.extract_strided_slice %14 {offsets = [0, 8], sizes = [16, 4], strides = [1, 1]} : vector<16x32xf32> to vector<16x4xf32>
    %58 = vector.shape_cast %57 : vector<16x4xf32> to vector<2x8x4xf32>
    "tpu.trace_start"() <{level = 10 : i32, message = "bnk,bmk->bnm"}> : () -> ()
    %cst_22 = arith.constant dense<0.000000e+00> : vector<2x8x8xf32>
    %59 = tpu.matmul %54, %56, %cst_22 {dimension_numbers = #tpu.dot_dimension_numbers<[2], [2], [1], [1], [0, 0, 0, 1, 1, 1], [0], [0]>} : vector<2x8x4xf32>, vector<2x8x4xf32>, vector<2x8x8xf32> -> vector<2x8x8xf32>
    "tpu.trace_stop"() : () -> ()
    %cst_23 = arith.constant dense<0xFF800000> : vector<2x8xf32>
    %60 = vector.multi_reduction <maximumf>, %59, %cst_23 [2] : vector<2x8x8xf32> to vector<2x8xf32>
    %61 = vector.shape_cast %60 : vector<2x8xf32> to vector<2x8x1xf32>
    %62 = vector.broadcast %61 : vector<2x8x1xf32> to vector<2x8x8xf32>
    %63 = arith.subf %59, %62 : vector<2x8x8xf32>
    %64 = math.exp %63 : vector<2x8x8xf32>
    %cst_24 = arith.constant dense<0.000000e+00> : vector<2x8xf32>
    %65 = vector.multi_reduction <add>, %64, %cst_24 [2] : vector<2x8x8xf32> to vector<2x8xf32>
    %66 = vector.shape_cast %65 : vector<2x8xf32> to vector<2x8x1xf32>
    %67 = tpu.reciprocal %66 {approx = true} : vector<2x8x1xf32> -> vector<2x8x1xf32>
    %68 = vector.broadcast %67 : vector<2x8x1xf32> to vector<2x8x8xf32>
    %69 = arith.mulf %64, %68 : vector<2x8x8xf32>
    "tpu.trace_start"() <{level = 10 : i32, message = "bnm,bmv->bnv"}> : () -> ()
    %cst_25 = arith.constant dense<0.000000e+00> : vector<2x8x4xf32>
    %70 = tpu.matmul %69, %58, %cst_25 {dimension_numbers = #tpu.dot_dimension_numbers<[2], [1], [1], [2], [0, 0, 0, 1, 1, 2], [0], [0]>} : vector<2x8x8xf32>, vector<2x8x4xf32>, vector<2x8x4xf32> -> vector<2x8x4xf32>
    "tpu.trace_stop"() : () -> ()
    %71 = vector.shape_cast %70 : vector<2x8x4xf32> to vector<16x4xf32>
    %72 = vector.extract_strided_slice %8 {offsets = [0, 12], sizes = [16, 4], strides = [1, 1]} : vector<16x32xf32> to vector<16x4xf32>
    %73 = vector.shape_cast %72 : vector<16x4xf32> to vector<2x8x4xf32>
    %74 = vector.extract_strided_slice %11 {offsets = [0, 12], sizes = [16, 4], strides = [1, 1]} : vector<16x32xf32> to vector<16x4xf32>
    %75 = vector.shape_cast %74 : vector<16x4xf32> to vector<2x8x4xf32>
    %76 = vector.extract_strided_slice %14 {offsets = [0, 12], sizes = [16, 4], strides = [1, 1]} : vector<16x32xf32> to vector<16x4xf32>
    %77 = vector.shape_cast %76 : vector<16x4xf32> to vector<2x8x4xf32>
    "tpu.trace_start"() <{level = 10 : i32, message = "bnk,bmk->bnm"}> : () -> ()
    %cst_26 = arith.constant dense<0.000000e+00> : vector<2x8x8xf32>
    %78 = tpu.matmul %73, %75, %cst_26 {dimension_numbers = #tpu.dot_dimension_numbers<[2], [2], [1], [1], [0, 0, 0, 1, 1, 1], [0], [0]>} : vector<2x8x4xf32>, vector<2x8x4xf32>, vector<2x8x8xf32> -> vector<2x8x8xf32>
    "tpu.trace_stop"() : () -> ()
    %cst_27 = arith.constant dense<0xFF800000> : vector<2x8xf32>
    %79 = vector.multi_reduction <maximumf>, %78, %cst_27 [2] : vector<2x8x8xf32> to vector<2x8xf32>
    %80 = vector.shape_cast %79 : vector<2x8xf32> to vector<2x8x1xf32>
    %81 = vector.broadcast %80 : vector<2x8x1xf32> to vector<2x8x8xf32>
    %82 = arith.subf %78, %81 : vector<2x8x8xf32>
    %83 = math.exp %82 : vector<2x8x8xf32>
    %cst_28 = arith.constant dense<0.000000e+00> : vector<2x8xf32>
    %84 = vector.multi_reduction <add>, %83, %cst_28 [2] : vector<2x8x8xf32> to vector<2x8xf32>
    %85 = vector.shape_cast %84 : vector<2x8xf32> to vector<2x8x1xf32>
    %86 = tpu.reciprocal %85 {approx = true} : vector<2x8x1xf32> -> vector<2x8x1xf32>
    %87 = vector.broadcast %86 : vector<2x8x1xf32> to vector<2x8x8xf32>
    %88 = arith.mulf %83, %87 : vector<2x8x8xf32>
    "tpu.trace_start"() <{level = 10 : i32, message = "bnm,bmv->bnv"}> : () -> ()
    %cst_29 = arith.constant dense<0.000000e+00> : vector<2x8x4xf32>
    %89 = tpu.matmul %88, %77, %cst_29 {dimension_numbers = #tpu.dot_dimension_numbers<[2], [1], [1], [2], [0, 0, 0, 1, 1, 2], [0], [0]>} : vector<2x8x8xf32>, vector<2x8x4xf32>, vector<2x8x4xf32> -> vector<2x8x4xf32>
    "tpu.trace_stop"() : () -> ()
    %90 = vector.shape_cast %89 : vector<2x8x4xf32> to vector<16x4xf32>
    %91 = vector.extract_strided_slice %8 {offsets = [0, 16], sizes = [16, 4], strides = [1, 1]} : vector<16x32xf32> to vector<16x4xf32>
    %92 = vector.shape_cast %91 : vector<16x4xf32> to vector<2x8x4xf32>
    %93 = vector.extract_strided_slice %11 {offsets = [0, 16], sizes = [16, 4], strides = [1, 1]} : vector<16x32xf32> to vector<16x4xf32>
    %94 = vector.shape_cast %93 : vector<16x4xf32> to vector<2x8x4xf32>
    %95 = vector.extract_strided_slice %14 {offsets = [0, 16], sizes = [16, 4], strides = [1, 1]} : vector<16x32xf32> to vector<16x4xf32>
    %96 = vector.shape_cast %95 : vector<16x4xf32> to vector<2x8x4xf32>
    "tpu.trace_start"() <{level = 10 : i32, message = "bnk,bmk->bnm"}> : () -> ()
    %cst_30 = arith.constant dense<0.000000e+00> : vector<2x8x8xf32>
    %97 = tpu.matmul %92, %94, %cst_30 {dimension_numbers = #tpu.dot_dimension_numbers<[2], [2], [1], [1], [0, 0, 0, 1, 1, 1], [0], [0]>} : vector<2x8x4xf32>, vector<2x8x4xf32>, vector<2x8x8xf32> -> vector<2x8x8xf32>
    "tpu.trace_stop"() : () -> ()
    %cst_31 = arith.constant dense<0xFF800000> : vector<2x8xf32>
    %98 = vector.multi_reduction <maximumf>, %97, %cst_31 [2] : vector<2x8x8xf32> to vector<2x8xf32>
    %99 = vector.shape_cast %98 : vector<2x8xf32> to vector<2x8x1xf32>
    %100 = vector.broadcast %99 : vector<2x8x1xf32> to vector<2x8x8xf32>
    %101 = arith.subf %97, %100 : vector<2x8x8xf32>
    %102 = math.exp %101 : vector<2x8x8xf32>
    %cst_32 = arith.constant dense<0.000000e+00> : vector<2x8xf32>
    %103 = vector.multi_reduction <add>, %102, %cst_32 [2] : vector<2x8x8xf32> to vector<2x8xf32>
    %104 = vector.shape_cast %103 : vector<2x8xf32> to vector<2x8x1xf32>
    %105 = tpu.reciprocal %104 {approx = true} : vector<2x8x1xf32> -> vector<2x8x1xf32>
    %106 = vector.broadcast %105 : vector<2x8x1xf32> to vector<2x8x8xf32>
    %107 = arith.mulf %102, %106 : vector<2x8x8xf32>
    "tpu.trace_start"() <{level = 10 : i32, message = "bnm,bmv->bnv"}> : () -> ()
    %cst_33 = arith.constant dense<0.000000e+00> : vector<2x8x4xf32>
    %108 = tpu.matmul %107, %96, %cst_33 {dimension_numbers = #tpu.dot_dimension_numbers<[2], [1], [1], [2], [0, 0, 0, 1, 1, 2], [0], [0]>} : vector<2x8x8xf32>, vector<2x8x4xf32>, vector<2x8x4xf32> -> vector<2x8x4xf32>
    "tpu.trace_stop"() : () -> ()
    %109 = vector.shape_cast %108 : vector<2x8x4xf32> to vector<16x4xf32>
    %110 = vector.extract_strided_slice %8 {offsets = [0, 20], sizes = [16, 4], strides = [1, 1]} : vector<16x32xf32> to vector<16x4xf32>
    %111 = vector.shape_cast %110 : vector<16x4xf32> to vector<2x8x4xf32>
    %112 = vector.extract_strided_slice %11 {offsets = [0, 20], sizes = [16, 4], strides = [1, 1]} : vector<16x32xf32> to vector<16x4xf32>
    %113 = vector.shape_cast %112 : vector<16x4xf32> to vector<2x8x4xf32>
    %114 = vector.extract_strided_slice %14 {offsets = [0, 20], sizes = [16, 4], strides = [1, 1]} : vector<16x32xf32> to vector<16x4xf32>
    %115 = vector.shape_cast %114 : vector<16x4xf32> to vector<2x8x4xf32>
    "tpu.trace_start"() <{level = 10 : i32, message = "bnk,bmk->bnm"}> : () -> ()
    %cst_34 = arith.constant dense<0.000000e+00> : vector<2x8x8xf32>
    %116 = tpu.matmul %111, %113, %cst_34 {dimension_numbers = #tpu.dot_dimension_numbers<[2], [2], [1], [1], [0, 0, 0, 1, 1, 1], [0], [0]>} : vector<2x8x4xf32>, vector<2x8x4xf32>, vector<2x8x8xf32> -> vector<2x8x8xf32>
    "tpu.trace_stop"() : () -> ()
    %cst_35 = arith.constant dense<0xFF800000> : vector<2x8xf32>
    %117 = vector.multi_reduction <maximumf>, %116, %cst_35 [2] : vector<2x8x8xf32> to vector<2x8xf32>
    %118 = vector.shape_cast %117 : vector<2x8xf32> to vector<2x8x1xf32>
    %119 = vector.broadcast %118 : vector<2x8x1xf32> to vector<2x8x8xf32>
    %120 = arith.subf %116, %119 : vector<2x8x8xf32>
    %121 = math.exp %120 : vector<2x8x8xf32>
    %cst_36 = arith.constant dense<0.000000e+00> : vector<2x8xf32>
    %122 = vector.multi_reduction <add>, %121, %cst_36 [2] : vector<2x8x8xf32> to vector<2x8xf32>
    %123 = vector.shape_cast %122 : vector<2x8xf32> to vector<2x8x1xf32>
    %124 = tpu.reciprocal %123 {approx = true} : vector<2x8x1xf32> -> vector<2x8x1xf32>
    %125 = vector.broadcast %124 : vector<2x8x1xf32> to vector<2x8x8xf32>
    %126 = arith.mulf %121, %125 : vector<2x8x8xf32>
    "tpu.trace_start"() <{level = 10 : i32, message = "bnm,bmv->bnv"}> : () -> ()
    %cst_37 = arith.constant dense<0.000000e+00> : vector<2x8x4xf32>
    %127 = tpu.matmul %126, %115, %cst_37 {dimension_numbers = #tpu.dot_dimension_numbers<[2], [1], [1], [2], [0, 0, 0, 1, 1, 2], [0], [0]>} : vector<2x8x8xf32>, vector<2x8x4xf32>, vector<2x8x4xf32> -> vector<2x8x4xf32>
    "tpu.trace_stop"() : () -> ()
    %128 = vector.shape_cast %127 : vector<2x8x4xf32> to vector<16x4xf32>
    %129 = vector.extract_strided_slice %8 {offsets = [0, 24], sizes = [16, 4], strides = [1, 1]} : vector<16x32xf32> to vector<16x4xf32>
    %130 = vector.shape_cast %129 : vector<16x4xf32> to vector<2x8x4xf32>
    %131 = vector.extract_strided_slice %11 {offsets = [0, 24], sizes = [16, 4], strides = [1, 1]} : vector<16x32xf32> to vector<16x4xf32>
    %132 = vector.shape_cast %131 : vector<16x4xf32> to vector<2x8x4xf32>
    %133 = vector.extract_strided_slice %14 {offsets = [0, 24], sizes = [16, 4], strides = [1, 1]} : vector<16x32xf32> to vector<16x4xf32>
    %134 = vector.shape_cast %133 : vector<16x4xf32> to vector<2x8x4xf32>
    "tpu.trace_start"() <{level = 10 : i32, message = "bnk,bmk->bnm"}> : () -> ()
    %cst_38 = arith.constant dense<0.000000e+00> : vector<2x8x8xf32>
    %135 = tpu.matmul %130, %132, %cst_38 {dimension_numbers = #tpu.dot_dimension_numbers<[2], [2], [1], [1], [0, 0, 0, 1, 1, 1], [0], [0]>} : vector<2x8x4xf32>, vector<2x8x4xf32>, vector<2x8x8xf32> -> vector<2x8x8xf32>
    "tpu.trace_stop"() : () -> ()
    %cst_39 = arith.constant dense<0xFF800000> : vector<2x8xf32>
    %136 = vector.multi_reduction <maximumf>, %135, %cst_39 [2] : vector<2x8x8xf32> to vector<2x8xf32>
    %137 = vector.shape_cast %136 : vector<2x8xf32> to vector<2x8x1xf32>
    %138 = vector.broadcast %137 : vector<2x8x1xf32> to vector<2x8x8xf32>
    %139 = arith.subf %135, %138 : vector<2x8x8xf32>
    %140 = math.exp %139 : vector<2x8x8xf32>
    %cst_40 = arith.constant dense<0.000000e+00> : vector<2x8xf32>
    %141 = vector.multi_reduction <add>, %140, %cst_40 [2] : vector<2x8x8xf32> to vector<2x8xf32>
    %142 = vector.shape_cast %141 : vector<2x8xf32> to vector<2x8x1xf32>
    %143 = tpu.reciprocal %142 {approx = true} : vector<2x8x1xf32> -> vector<2x8x1xf32>
    %144 = vector.broadcast %143 : vector<2x8x1xf32> to vector<2x8x8xf32>
    %145 = arith.mulf %140, %144 : vector<2x8x8xf32>
    "tpu.trace_start"() <{level = 10 : i32, message = "bnm,bmv->bnv"}> : () -> ()
    %cst_41 = arith.constant dense<0.000000e+00> : vector<2x8x4xf32>
    %146 = tpu.matmul %145, %134, %cst_41 {dimension_numbers = #tpu.dot_dimension_numbers<[2], [1], [1], [2], [0, 0, 0, 1, 1, 2], [0], [0]>} : vector<2x8x8xf32>, vector<2x8x4xf32>, vector<2x8x4xf32> -> vector<2x8x4xf32>
    "tpu.trace_stop"() : () -> ()
    %147 = vector.shape_cast %146 : vector<2x8x4xf32> to vector<16x4xf32>
    %148 = vector.extract_strided_slice %8 {offsets = [0, 28], sizes = [16, 4], strides = [1, 1]} : vector<16x32xf32> to vector<16x4xf32>
    %149 = vector.shape_cast %148 : vector<16x4xf32> to vector<2x8x4xf32>
    %150 = vector.extract_strided_slice %11 {offsets = [0, 28], sizes = [16, 4], strides = [1, 1]} : vector<16x32xf32> to vector<16x4xf32>
    %151 = vector.shape_cast %150 : vector<16x4xf32> to vector<2x8x4xf32>
    %152 = vector.extract_strided_slice %14 {offsets = [0, 28], sizes = [16, 4], strides = [1, 1]} : vector<16x32xf32> to vector<16x4xf32>
    %153 = vector.shape_cast %152 : vector<16x4xf32> to vector<2x8x4xf32>
    "tpu.trace_start"() <{level = 10 : i32, message = "bnk,bmk->bnm"}> : () -> ()
    %cst_42 = arith.constant dense<0.000000e+00> : vector<2x8x8xf32>
    %154 = tpu.matmul %149, %151, %cst_42 {dimension_numbers = #tpu.dot_dimension_numbers<[2], [2], [1], [1], [0, 0, 0, 1, 1, 1], [0], [0]>} : vector<2x8x4xf32>, vector<2x8x4xf32>, vector<2x8x8xf32> -> vector<2x8x8xf32>
    "tpu.trace_stop"() : () -> ()
    %cst_43 = arith.constant dense<0xFF800000> : vector<2x8xf32>
    %155 = vector.multi_reduction <maximumf>, %154, %cst_43 [2] : vector<2x8x8xf32> to vector<2x8xf32>
    %156 = vector.shape_cast %155 : vector<2x8xf32> to vector<2x8x1xf32>
    %157 = vector.broadcast %156 : vector<2x8x1xf32> to vector<2x8x8xf32>
    %158 = arith.subf %154, %157 : vector<2x8x8xf32>
    %159 = math.exp %158 : vector<2x8x8xf32>
    %cst_44 = arith.constant dense<0.000000e+00> : vector<2x8xf32>
    %160 = vector.multi_reduction <add>, %159, %cst_44 [2] : vector<2x8x8xf32> to vector<2x8xf32>
    %161 = vector.shape_cast %160 : vector<2x8xf32> to vector<2x8x1xf32>
    %162 = tpu.reciprocal %161 {approx = true} : vector<2x8x1xf32> -> vector<2x8x1xf32>
    %163 = vector.broadcast %162 : vector<2x8x1xf32> to vector<2x8x8xf32>
    %164 = arith.mulf %159, %163 : vector<2x8x8xf32>
    "tpu.trace_start"() <{level = 10 : i32, message = "bnm,bmv->bnv"}> : () -> ()
    %cst_45 = arith.constant dense<0.000000e+00> : vector<2x8x4xf32>
    %165 = tpu.matmul %164, %153, %cst_45 {dimension_numbers = #tpu.dot_dimension_numbers<[2], [1], [1], [2], [0, 0, 0, 1, 1, 2], [0], [0]>} : vector<2x8x8xf32>, vector<2x8x4xf32>, vector<2x8x4xf32> -> vector<2x8x4xf32>
    "tpu.trace_stop"() : () -> ()
    %166 = vector.shape_cast %165 : vector<2x8x4xf32> to vector<16x4xf32>
    %167 = tpu.concatenate %33, %52, %71, %90, %109, %128, %147, %166 in 1 : vector<16x4xf32>, vector<16x4xf32>, vector<16x4xf32>, vector<16x4xf32>, vector<16x4xf32>, vector<16x4xf32>, vector<16x4xf32>, vector<16x4xf32> -> vector<16x32xf32>
    %168 = arith.truncf %167 : vector<16x32xf32> to vector<16x32xbf16>
    %c0_46 = arith.constant 0 : index
    %c0_47 = arith.constant 0 : index
    %c0_48 = arith.constant 0 : index
    %169 = vector.load %arg7[%c0_46, %c0_47, %c0_48] : memref<1x32x32xbf16, #tpu.memory_space<vmem>>, vector<1x32x32xbf16>
    %170 = vector.shape_cast %169 : vector<1x32x32xbf16> to vector<32x32xbf16>
    %cst_49 = arith.constant dense<0.000000e+00> : vector<16x32xf32>
    %171 = tpu.matmul %168, %170, %cst_49 {dimension_numbers = #tpu.dot_dimension_numbers<[1], [0], [0], [1], [0, 0, 1, 1], [], []>} : vector<16x32xbf16>, vector<32x32xbf16>, vector<16x32xf32> -> vector<16x32xf32>
    %172 = arith.addf %4, %171 : vector<16x32xf32>
    %cst_50 = arith.constant dense<0.000000e+00> : vector<32xf32>
    %173 = vector.multi_reduction <add>, %172, %cst_50 [0] : vector<16x32xf32> to vector<32xf32>
    %174 = vector.shape_cast %173 : vector<32xf32> to vector<1x32xf32>
    %cst_51 = arith.constant 1.600000e+01 : f32
    %175 = vector.broadcast %cst_51 : f32 to vector<1x32xf32>
    %176 = arith.divf %174, %175 : vector<1x32xf32>
    %177 = vector.broadcast %176 : vector<1x32xf32> to vector<16x32xf32>
    %178 = arith.subf %172, %177 : vector<16x32xf32>
    %179 = arith.mulf %178, %178 : vector<16x32xf32>
    %cst_52 = arith.constant dense<0.000000e+00> : vector<32xf32>
    %180 = vector.multi_reduction <add>, %179, %cst_52 [0] : vector<16x32xf32> to vector<32xf32>
    %181 = vector.shape_cast %180 : vector<32xf32> to vector<1x32xf32>
    %cst_53 = arith.constant 1.600000e+01 : f32
    %182 = vector.broadcast %cst_53 : f32 to vector<1x32xf32>
    %183 = arith.divf %181, %182 : vector<1x32xf32>
    %184 = vector.broadcast %176 : vector<1x32xf32> to vector<16x32xf32>
    %185 = arith.subf %172, %184 : vector<16x32xf32>
    %cst_54 = arith.constant 9.99999974E-6 : f32
    %186 = vector.broadcast %cst_54 : f32 to vector<1x32xf32>
    %187 = arith.addf %183, %186 : vector<1x32xf32>
    %188 = math.rsqrt %187 : vector<1x32xf32>
    %189 = vector.broadcast %188 : vector<1x32xf32> to vector<16x32xf32>
    %190 = arith.mulf %185, %189 : vector<16x32xf32>
    %c0_55 = arith.constant 0 : index
    %c0_56 = arith.constant 0 : index
    %c0_57 = arith.constant 0 : index
    %191 = vector.load %arg8[%c0_55, %c0_56, %c0_57] : memref<1x1x32xf32, #tpu.memory_space<vmem>>, vector<1x1x32xf32>
    %192 = vector.shape_cast %191 : vector<1x1x32xf32> to vector<1x32xf32>
    %193 = vector.broadcast %192 : vector<1x32xf32> to vector<16x32xf32>
    %194 = arith.mulf %190, %193 : vector<16x32xf32>
    %c0_58 = arith.constant 0 : index
    %c0_59 = arith.constant 0 : index
    %c0_60 = arith.constant 0 : index
    %195 = vector.load %arg9[%c0_58, %c0_59, %c0_60] : memref<1x1x32xf32, #tpu.memory_space<vmem>>, vector<1x1x32xf32>
    %196 = vector.shape_cast %195 : vector<1x1x32xf32> to vector<1x32xf32>
    %197 = vector.broadcast %196 : vector<1x32xf32> to vector<16x32xf32>
    %198 = arith.addf %194, %197 : vector<16x32xf32>
    %199 = arith.truncf %198 : vector<16x32xf32> to vector<16x32xbf16>
    %c0_61 = arith.constant 0 : index
    %c0_62 = arith.constant 0 : index
    %c0_63 = arith.constant 0 : index
    %200 = vector.load %arg10[%c0_61, %c0_62, %c0_63] : memref<1x32x64xbf16, #tpu.memory_space<vmem>>, vector<1x32x64xbf16>
    %201 = vector.shape_cast %200 : vector<1x32x64xbf16> to vector<32x64xbf16>
    %cst_64 = arith.constant dense<0.000000e+00> : vector<16x64xf32>
    %202 = tpu.matmul %199, %201, %cst_64 {dimension_numbers = #tpu.dot_dimension_numbers<[1], [0], [0], [1], [0, 0, 1, 1], [], []>} : vector<16x32xbf16>, vector<32x64xbf16>, vector<16x64xf32> -> vector<16x64xf32>
    %c0_65 = arith.constant 0 : index
    %c0_66 = arith.constant 0 : index
    %c0_67 = arith.constant 0 : index
    %203 = vector.load %arg11[%c0_65, %c0_66, %c0_67] : memref<1x1x64xf32, #tpu.memory_space<vmem>>, vector<1x1x64xf32>
    %204 = vector.shape_cast %203 : vector<1x1x64xf32> to vector<1x64xf32>
    %205 = vector.broadcast %204 : vector<1x64xf32> to vector<16x64xf32>
    %206 = arith.addf %202, %205 : vector<16x64xf32>
    %cst_68 = arith.constant 0.000000e+00 : f32
    %207 = vector.broadcast %cst_68 : f32 to vector<16x64xf32>
    %208 = arith.maximumf %206, %207 : vector<16x64xf32>
    %209 = arith.truncf %208 : vector<16x64xf32> to vector<16x64xbf16>
    %c0_69 = arith.constant 0 : index
    %c0_70 = arith.constant 0 : index
    %c0_71 = arith.constant 0 : index
    %210 = vector.load %arg12[%c0_69, %c0_70, %c0_71] : memref<1x64x32xbf16, #tpu.memory_space<vmem>>, vector<1x64x32xbf16>
    %211 = vector.shape_cast %210 : vector<1x64x32xbf16> to vector<64x32xbf16>
    %cst_72 = arith.constant dense<0.000000e+00> : vector<16x32xf32>
    %212 = tpu.matmul %209, %211, %cst_72 {dimension_numbers = #tpu.dot_dimension_numbers<[1], [0], [0], [1], [0, 0, 1, 1], [], []>} : vector<16x64xbf16>, vector<64x32xbf16>, vector<16x32xf32> -> vector<16x32xf32>
    %c0_73 = arith.constant 0 : index
    %c0_74 = arith.constant 0 : index
    %c0_75 = arith.constant 0 : index
    %213 = vector.load %arg13[%c0_73, %c0_74, %c0_75] : memref<1x1x32xf32, #tpu.memory_space<vmem>>, vector<1x1x32xf32>
    %214 = vector.shape_cast %213 : vector<1x1x32xf32> to vector<1x32xf32>
    %215 = vector.broadcast %214 : vector<1x32xf32> to vector<16x32xf32>
    %216 = arith.addf %212, %215 : vector<16x32xf32>
    %217 = arith.addf %198, %216 : vector<16x32xf32>
    %cst_76 = arith.constant dense<0.000000e+00> : vector<32xf32>
    %218 = vector.multi_reduction <add>, %217, %cst_76 [0] : vector<16x32xf32> to vector<32xf32>
    %219 = vector.shape_cast %218 : vector<32xf32> to vector<1x32xf32>
    %cst_77 = arith.constant 1.600000e+01 : f32
    %220 = vector.broadcast %cst_77 : f32 to vector<1x32xf32>
    %221 = arith.divf %219, %220 : vector<1x32xf32>
    %222 = vector.broadcast %221 : vector<1x32xf32> to vector<16x32xf32>
    %223 = arith.subf %217, %222 : vector<16x32xf32>
    %224 = arith.mulf %223, %223 : vector<16x32xf32>
    %cst_78 = arith.constant dense<0.000000e+00> : vector<32xf32>
    %225 = vector.multi_reduction <add>, %224, %cst_78 [0] : vector<16x32xf32> to vector<32xf32>
    %226 = vector.shape_cast %225 : vector<32xf32> to vector<1x32xf32>
    %cst_79 = arith.constant 1.600000e+01 : f32
    %227 = vector.broadcast %cst_79 : f32 to vector<1x32xf32>
    %228 = arith.divf %226, %227 : vector<1x32xf32>
    %229 = vector.broadcast %221 : vector<1x32xf32> to vector<16x32xf32>
    %230 = arith.subf %217, %229 : vector<16x32xf32>
    %cst_80 = arith.constant 9.99999974E-6 : f32
    %231 = vector.broadcast %cst_80 : f32 to vector<1x32xf32>
    %232 = arith.addf %228, %231 : vector<1x32xf32>
    %233 = math.rsqrt %232 : vector<1x32xf32>
    %234 = vector.broadcast %233 : vector<1x32xf32> to vector<16x32xf32>
    %235 = arith.mulf %230, %234 : vector<16x32xf32>
    %c0_81 = arith.constant 0 : index
    %c0_82 = arith.constant 0 : index
    %c0_83 = arith.constant 0 : index
    %236 = vector.load %arg14[%c0_81, %c0_82, %c0_83] : memref<1x1x32xf32, #tpu.memory_space<vmem>>, vector<1x1x32xf32>
    %237 = vector.shape_cast %236 : vector<1x1x32xf32> to vector<1x32xf32>
    %238 = vector.broadcast %237 : vector<1x32xf32> to vector<16x32xf32>
    %239 = arith.mulf %235, %238 : vector<16x32xf32>
    %c0_84 = arith.constant 0 : index
    %c0_85 = arith.constant 0 : index
    %c0_86 = arith.constant 0 : index
    %240 = vector.load %arg15[%c0_84, %c0_85, %c0_86] : memref<1x1x32xf32, #tpu.memory_space<vmem>>, vector<1x1x32xf32>
    %241 = vector.shape_cast %240 : vector<1x1x32xf32> to vector<1x32xf32>
    %242 = vector.broadcast %241 : vector<1x32xf32> to vector<16x32xf32>
    %243 = arith.addf %239, %242 : vector<16x32xf32>
    %244 = vector.shape_cast %243 : vector<16x32xf32> to vector<2x8x32xf32>
    %c0_87 = arith.constant 0 : index
    %c0_88 = arith.constant 0 : index
    %c0_89 = arith.constant 0 : index
    %245 = vector.load %arg16[%c0_87, %c0_88, %c0_89] : memref<2x8x32xf32, #tpu.memory_space<vmem>>, vector<2x8x32xf32>
    tpu.vector_store %arg16[%c0_87, %c0_88, %c0_89], %244 {strides = array<i32>} : memref<2x8x32xf32, #tpu.memory_space<vmem>>, vector<2x8x32xf32>,
    %c1_i32 = arith.constant 1 : i32
    %246 = arith.cmpi eq, %arg0, %c1_i32 : i32
    %247 = arith.extui %246 : i1 to i32
    %c0_i32_90 = arith.constant 0 : i32
    %248 = arith.cmpi ne, %247, %c0_i32_90 : i32
    scf.if %248 {
      %cst_91 = arith.constant dense<0.000000e+00> : vector<2x32xf32>
      %249 = vector.multi_reduction <add>, %244, %cst_91 [1] : vector<2x8x32xf32> to vector<2x32xf32>
      %cst_92 = arith.constant 8.000000e+00 : f32
      %250 = vector.broadcast %cst_92 : f32 to vector<2x32xf32>
      %251 = arith.divf %249, %250 : vector<2x32xf32>
      %c0_93 = arith.constant 0 : index
      %c0_94 = arith.constant 0 : index
      %252 = vector.load %arg17[%c0_93, %c0_94] : memref<2x32xf32, #tpu.memory_space<vmem>>, vector<2x32xf32>
      tpu.vector_store %arg17[%c0_93, %c0_94], %251 {strides = array<i32>} : memref<2x32xf32, #tpu.memory_space<vmem>>, vector<2x32xf32>,
    } else {
    }
    return
  }
  func.func @transform_0(%arg0: i32) -> (i32, i32, i32) {
    %c0_i32 = arith.constant 0 : i32
    %c0_i32_0 = arith.constant 0 : i32
    %c0_i32_1 = arith.constant 0 : i32
    %c0_i32_2 = arith.constant 0 : i32
    return %c0_i32, %c0_i32_0, %c0_i32_1 : i32, i32, i32
  }
  func.func @transform_1(%arg0: i32) -> (i32, i32) {
    %c0_i32 = arith.constant 0 : i32
    %c0_i32_0 = arith.constant 0 : i32
    %c0_i32_1 = arith.constant 0 : i32
    return %c0_i32, %c0_i32_0 : i32, i32
  }
  func.func @transform_2(%arg0: i32) -> (i32, i32) {
    %c0_i32 = arith.constant 0 : i32
    %c0_i32_0 = arith.constant 0 : i32
    %c0_i32_1 = arith.constant 0 : i32
    return %c0_i32, %c0_i32_0 : i32, i32
  }
  func.func @transform_3(%arg0: i32) -> (i32, i32, i32) {
    %c0_i32 = arith.constant 0 : i32
    %c0_i32_0 = arith.constant 0 : i32
    %c0_i32_1 = arith.constant 0 : i32
    return %arg0, %c0_i32, %c0_i32_0 : i32, i32, i32
  }
  func.func @transform_4(%arg0: i32) -> (i32, i32, i32) {
    %c0_i32 = arith.constant 0 : i32
    %c0_i32_0 = arith.constant 0 : i32
    %c0_i32_1 = arith.constant 0 : i32
    return %arg0, %c0_i32, %c0_i32_0 : i32, i32, i32
  }
  func.func @transform_5(%arg0: i32) -> (i32, i32, i32) {
    %c0_i32 = arith.constant 0 : i32
    %c0_i32_0 = arith.constant 0 : i32
    %c0_i32_1 = arith.constant 0 : i32
    return %arg0, %c0_i32, %c0_i32_0 : i32, i32, i32
  }
  func.func @transform_6(%arg0: i32) -> (i32, i32, i32) {
    %c0_i32 = arith.constant 0 : i32
    %c0_i32_0 = arith.constant 0 : i32
    %c0_i32_1 = arith.constant 0 : i32
    return %arg0, %c0_i32, %c0_i32_0 : i32, i32, i32
  }
  func.func @transform_7(%arg0: i32) -> (i32, i32, i32) {
    %c0_i32 = arith.constant 0 : i32
    %c0_i32_0 = arith.constant 0 : i32
    %c0_i32_1 = arith.constant 0 : i32
    return %arg0, %c0_i32, %c0_i32_0 : i32, i32, i32
  }
  func.func @transform_8(%arg0: i32) -> (i32, i32, i32) {
    %c0_i32 = arith.constant 0 : i32
    %c0_i32_0 = arith.constant 0 : i32
    %c0_i32_1 = arith.constant 0 : i32
    return %arg0, %c0_i32, %c0_i32_0 : i32, i32, i32
  }
  func.func @transform_9(%arg0: i32) -> (i32, i32, i32) {
    %c0_i32 = arith.constant 0 : i32
    %c0_i32_0 = arith.constant 0 : i32
    %c0_i32_1 = arith.constant 0 : i32
    return %arg0, %c0_i32, %c0_i32_0 : i32, i32, i32
  }
  func.func @transform_10(%arg0: i32) -> (i32, i32, i32) {
    %c0_i32 = arith.constant 0 : i32
    %c0_i32_0 = arith.constant 0 : i32
    %c0_i32_1 = arith.constant 0 : i32
    return %arg0, %c0_i32, %c0_i32_0 : i32, i32, i32
  }
  func.func @transform_11(%arg0: i32) -> (i32, i32, i32) {
    %c0_i32 = arith.constant 0 : i32
    %c0_i32_0 = arith.constant 0 : i32
    %c0_i32_1 = arith.constant 0 : i32
    return %arg0, %c0_i32, %c0_i32_0 : i32, i32, i32
  }
  func.func @transform_12(%arg0: i32) -> (i32, i32, i32) {
    %c0_i32 = arith.constant 0 : i32
    %c0_i32_0 = arith.constant 0 : i32
    %c0_i32_1 = arith.constant 0 : i32
    return %arg0, %c0_i32, %c0_i32_0 : i32, i32, i32
  }
  func.func @transform_13(%arg0: i32) -> (i32, i32, i32) {
    %c0_i32 = arith.constant 0 : i32
    %c0_i32_0 = arith.constant 0 : i32
    %c0_i32_1 = arith.constant 0 : i32
    return %arg0, %c0_i32, %c0_i32_0 : i32, i32, i32
  }
  func.func @transform_14(%arg0: i32) -> (i32, i32, i32) {
    %c0_i32 = arith.constant 0 : i32
    %c0_i32_0 = arith.constant 0 : i32
    %c0_i32_1 = arith.constant 0 : i32
    return %arg0, %c0_i32, %c0_i32_0 : i32, i32, i32
  }
  func.func @transform_15(%arg0: i32) -> (i32, i32, i32) {
    %c0_i32 = arith.constant 0 : i32
    %c0_i32_0 = arith.constant 0 : i32
    %c0_i32_1 = arith.constant 0 : i32
    %c0_i32_2 = arith.constant 0 : i32
    return %c0_i32, %c0_i32_0, %c0_i32_1 : i32, i32, i32
  }
  func.func @transform_16(%arg0: i32) -> (i32, i32) {
    %c0_i32 = arith.constant 0 : i32
    %c0_i32_0 = arith.constant 0 : i32
    %c0_i32_1 = arith.constant 0 : i32
    return %c0_i32, %c0_i32_0 : i32, i32
  }
}

</mosaic_0001>

<bundles_post_ra>
// kernel: tpu_custom_call.1
= control target key start
LH: loop header
LB: loop body
LE: loop exit
PB: predicated region body
PF: predicated region fallthrough
CT: control target
= control target key end

     0   :  { %s6011_s0 = inlined_call_operand.hbm [shape: f32[2,8,16], index: 0, kind: input, shape index: {}]   ;;  %s6012_s1 = inlined_call_operand.hbm [shape: bf16[16,32], index: 1, kind: input, shape index: {}]   ;;  %s6013_s2 = inlined_call_operand.vmem [shape: f32[1,32], index: 2, kind: input, shape index: {}]   ;;  %s6014_s3 = inlined_call_operand.vmem [shape: bf16[2,32,32], index: 3, kind: input, shape index: {}]   ;;  %s6015_s4 = inlined_call_operand.vmem [shape: bf16[2,32,32], index: 4, kind: input, shape index: {}]   ;;  %s6016_s5 = inlined_call_operand.vmem [shape: bf16[2,32,32], index: 5, kind: input, shape index: {}]   ;;  %s6017_s6 = inlined_call_operand.hbm [shape: bf16[2,32,32], index: 6, kind: input, shape index: {}]   ;;  %s6018_s7 = inlined_call_operand.vmem [shape: f32[2,1,32], index: 7, kind: input, shape index: {}]   ;;  %s6019_s8 = inlined_call_operand.vmem [shape: f32[2,1,32], index: 8, kind: input, shape index: {}]   ;;  %s6020_s9 = inlined_call_operand.hbm [shape: bf16[2,32,64], index: 9, kind: input, shape index: {}]   ;;  %s6021_s10 = inlined_call_operand.vmem [shape: f32[2,1,64], index: 10, kind: input, shape index: {}]   ;;  %s6022_s11 = inlined_call_operand.vmem [shape: bf16[2,64,32], index: 11, kind: input, shape index: {}]   ;;  %s6023_s12 = inlined_call_operand.vmem [shape: f32[2,1,32], index: 12, kind: input, shape index: {}]   ;;  %s6024_s13 = inlined_call_operand.vmem [shape: f32[2,1,32], index: 13, kind: input, shape index: {}]   ;;  %s6025_s14 = inlined_call_operand.vmem [shape: f32[2,1,32], index: 14, kind: input, shape index: {}]   ;;  %s6026_s15 = inlined_call_operand.hbm [shape: f32[2,8,32], index: 15, kind: output, shape index: {0}]   ;;  %s6027_s16 = inlined_call_operand.hbm [shape: f32[2,32], index: 16, kind: output, shape index: {1}]  }
   0x1   :  { %6042 = sst [smem:[#allocation19_spill]] %s6011_s0 }
   0x2   :  { %6043 = sst [smem:[#allocation20_spill]] %s6012_s1 }
   0x3   :  { %6044 = sst [smem:[#allocation21_spill]] %s6013_s2 }
   0x4   :  { %6045 = sst [smem:[#allocation22_spill]] %s6014_s3 }
   0x5   :  { %6046 = sst [smem:[#allocation23_spill]] %s6015_s4 }
   0x6   :  { %6047 = sst [smem:[#allocation24_spill]] %s6016_s5 }
   0x7   :  { %6048 = sst [smem:[#allocation25_spill]] %s6017_s6 }
   0x8   :  { %6049 = sst [smem:[#allocation26_spill]] %s6020_s9 }
   0x9   :  { %6050 = sst [smem:[#allocation27_spill]] %s6022_s11 }
   0xa   :  { %6051 = sst [smem:[#allocation28_spill]] %s6023_s12 }
   0xb   :  { %6052 = sst [smem:[#allocation29_spill]] %s6024_s13 }
   0xc   :  { %6053 = sst [smem:[#allocation30_spill]] %s6025_s14 }
   0xd   :  { %6054 = sst [smem:[#allocation31_spill]] %s6026_s15 }
   0xe   :  { %6055 = sst [smem:[#allocation32_spill]] %s6027_s16 }
   0xf   :  { %22 = vsyncpa [#allocation3], 0 }
  0x10   :  { %23 = vsyncpa [#allocation6], 0 }
  0x11   :  { %24 = vsyncpa [#allocation4], 0 }
  0x12   :  { %25 = vsyncpa [#allocation11], 0  ;;  %s5253_s21 = smov 0   ;;  %s5255_s22 = smov 0  }
  0x13   :  { %s5257_s23 = smov 0   ;;  %s5259_s24 = smov 0  }
  0x14 LB: > { %s5272_s25 = sadd.s32 4294967295, %s5137_s24   ;;  %s5275_s26 = sadd.s32 1, %s5137_s24   ;;  %s5137_s24 = sphi %s5259_s24, %s6098_s24   ;;  %s5133_s23 = sphi %s5257_s23, %s6102_s23   ;;  %s5129_s22 = sphi %s5255_s22, %s6101_s22   ;;  %s5125_s21 = sphi %s5253_s21, %s6100_s21  }
  0x15   : > { %6056 = sst [smem:[#allocation17_spill]] %s5275_s26  ;;  %s176_s27 = ssub.s32 %s5137_s24, %s5275_s26 }
  0x16   : > { %s179_s28 = sadd.s32 1, %s5133_s23  ;;  %p177_p0 = scmp.eq.s32.totalorder %s176_s27, 0 }
  0x17   : > { %p186_p1 = scmp.ne.s32.totalorder %s5133_s23, %s5129_s22  ;;  %p187_p2 = scmp.eq.s32.totalorder %s5137_s24, 0 }
  0x18   : > { %p192_p3 = scmp.ne.s32.totalorder %s5129_s22, %s5125_s21  ;;  %p6033_p5 = scmp.eq.s32.totalorder %s5272_s25, 0 }
  0x19   : > { %s5285_s29 = scalar_select %p177_p0, %s5133_s23, %s179_s28  }
  0x1a   : > { %p5287_p4 = por %p187_p2, %p186_p1  ;;  %p4279_p6 = scmp.ge.s32.totalorder %s5137_s24, 1 }
  0x1b   : > { %6057 = sst [smem:[#allocation18_spill]] %s5285_s29  ;;  %p453_p7 = scmp.lt.s32.totalorder %s5137_s24, 3 }
  0x1c   : > { %p5296_p8 = por %p6033_p5, %p192_p3  ;;  %s5139_s18 = smov [#allocation2]  }
  0x1d   : > { %p5301_p10 = pnand %p4279_p6, %p453_p7  ;;  %s465_s19 = sshll.u32 %s5139_s18, 4  ;;  %s466_s19 = int_to_ptr.vmem [resolvable:$true] %s465_s19 }
  0x1e   : > { %s6059_s0 = scalar_select %p5296_p8, 1, 0 }
  0x1f   : > { %s6060_s17 = scalar_select %p5301_p10, 1, 0 }
  0x20   : > { %p4717_p11 = pneg %p5301_p10  ;;  %p4733_p13 = scmp.lt.s32.totalorder %s5137_s24, 2 }
  0x21   : > { %s6063_s29 = sld [smem:[#allocation19_spill]] }
  0x22   : > { %p5309_p12 = pnand %p4717_p11, %p6033_p5  ;;  %p5316_p0 = pnand %p4733_p13, %p5287_p4 }
  0x24   : > { %s6062_s21 = scalar_select %p5316_p0, 1, 0 }
  0x25   : > { %p6038_p2 = pneg %p5309_p12 }
  0x27   : > { %s4919_s18 = scalar_lea.hbm %s6063_s29, 256 }
  0x28   : > { %p4920_p1 = scmp.ne.s32.totalorder %s6063_s29, %s4919_s18  ;;  %p4926_p4 = scmp.lt.u32.totalorder %s4919_s18, %s6063_s29 }
  0x2a   : > { %p4922_p3 = pnand %p6038_p2, %p4920_p1 }
  0x2c   : > { %p4923_p6 = pneg %p4922_p3 }
  0x2e   : > { %p4928_p7 = pnand %p4926_p4, %p4923_p6 }
  0x30   : > { %4931 = shalt.err (!%p4928_p7)
}
  0x31   : > { %s4932_s2 = scalar_lea.vmem %s466_s19, 256  ;;  %p4940_p5 = scmp.lt.s32.totalorder %s466_s19, %s466_s19 }
  0x32   : > { %p4933_p11 = scmp.ne.s32.totalorder %s466_s19, %s4932_s2  ;;  %p4941_p8 = scmp.lt.s32.totalorder %s4932_s2, %s4932_s2 }
  0x34   : > { %p4935_p13 = pnand %p4933_p11, %p6038_p2  ;;  %p4942_p10 = por %p4941_p8, %p4940_p5 }
  0x36   : > { %p4936_p9 = pneg %p4935_p13 }
  0x38   : > { %p4943_p0 = pnand %p4942_p10, %p4936_p9 }
  0x3a   : > { %4946 = shalt.err (!%p4943_p0)
}
  0x3b   : > { %s5140_s16 = smov 128   ;;  %s5141_s15 = smov 8  }
  0x3c   : > { %4720 = dma.hbm_to_vmem [thread:$0]  (!%p5309_p12), %s6063_s29, 256, %s466_s19, [#allocation3], %s5140_s16, %s5140_s16, %s5141_s15  }
  0x3d   : > { %s519_s28 = sand.u32 1, %s5137_s24   ;;  %s521_s18 = sand.u32 1, %s5133_s23  }
  0x3e   : > { %s5344_s2 = sshll.u32 %s521_s18, 4  ;;  %s6037_s30 = sshll.u32 %s5137_s24, 8 }
  0x3f   : > { %s6064_s6 = sld [smem:[#allocation25_spill]]  ;;  %s523_s11 = scalar_lea.vmem [#allocation7], %s5344_s2 }
  0x40   : > { %s530_s26 = sshll.u32 %s523_s11, 4  ;;  %s5142_s19 = smov [#allocation5]   ;;  %s5355_s26 = int_to_ptr.vmem [resolvable:$true] %s530_s26 }
  0x41   : > { %s5357_s16 = sshll.u32 %s5142_s19, 4  ;;  %s5359_s15 = scalar_lea.sflag [#allocation3], %s519_s28  ;;  %s479_s16 = int_to_ptr.vmem [resolvable:$true] %s5357_s16 }
  0x42   : > { %p6065_p8 = scmp.ne.s32.totalorder %s6062_s21, 0 }
  0x44   : > { %p6039_p9 = pneg %p6065_p8 }
  0x45   : > { %s5352_s12 = scalar_lea.hbm %s6064_s6, %s6037_s30  ;;  %s4952_s18 = scalar_lea.hbm %s6064_s6, 512 }
  0x46   : > { %s4947_s27 = scalar_lea.hbm %s5352_s12, 256  ;;  %p4953_p1 = scmp.lt.u32.totalorder %s5352_s12, %s6064_s6 }
  0x47   : > { %p4948_p5 = scmp.ne.s32.totalorder %s5352_s12, %s4947_s27  ;;  %p4954_p3 = scmp.lt.u32.totalorder %s4952_s18, %s4947_s27 }
  0x48   : > { %p4956_p4 = scmp.lt.u32.totalorder %s4947_s27, %s5352_s12 }
  0x49   : > { %p4950_p10 = pnand %p6039_p9, %p4948_p5  ;;  %p4955_p6 = por %p4954_p3, %p4953_p1 }
  0x4b   : > { %p4951_p0 = pneg %p4950_p10  ;;  %p4957_p7 = por %p4956_p4, %p4955_p6 }
  0x4d   : > { %p4958_p11 = pnand %p4957_p7, %p4951_p0 }
  0x4f   : > { %4961 = shalt.err (!%p4958_p11)
}
  0x50   : > { %s4962_s28 = scalar_lea.vmem %s5355_s26, 256  ;;  %s5143_s19 = smov [#allocation7]  }
  0x51   : > { %p4963_p13 = scmp.ne.s32.totalorder %s5355_s26, %s4962_s28  ;;  %s4967_s13 = sshll.u32 %s5143_s19, 4  ;;  %s4968_s13 = int_to_ptr.vmem [resolvable:$false] %s4967_s13 }
  0x52   : > { %s4969_s30 = scalar_lea.vmem %s4968_s13, 512  ;;  %p4970_p2 = scmp.lt.s32.totalorder %s5355_s26, %s4968_s13 }
  0x53   : > { %p4965_p5 = pnand %p4963_p13, %p6039_p9  ;;  %p4971_p1 = scmp.lt.s32.totalorder %s4969_s30, %s4962_s28 }
  0x55   : > { %p4966_p10 = pneg %p4965_p5  ;;  %p4972_p3 = por %p4971_p1, %p4970_p2 }
  0x57   : > { %p4973_p6 = pnand %p4972_p3, %p4966_p10 }
  0x59   : > { %4976 = shalt.err (!%p4973_p6)
}
  0x5a   : > { %s5144_s27 = smov 64   ;;  %s5145_s14 = smov 4  }
  0x5b   : > { %4727 = dma.hbm_to_vmem [thread:$0]  (!%p6065_p8), %s5352_s12, 256, %s5355_s26, %s5359_s15, %s5144_s27, %s5144_s27, %s5145_s14  }
  0x5c   : > { %s6066_s1 = sld [smem:[#allocation20_spill]]  ;;  %p6067_p0 = pneg %p5309_p12 }
  0x62   : > { %s4977_s28 = scalar_lea.hbm %s6066_s1, 128 }
  0x63   : > { %p4978_p2 = scmp.ne.s32.totalorder %s6066_s1, %s4977_s28  ;;  %p4984_p11 = scmp.lt.u32.totalorder %s4977_s28, %s6066_s1 }
  0x65   : > { %p4980_p4 = pnand %p4978_p2, %p6067_p0 }
  0x67   : > { %p4981_p7 = pneg %p4980_p4 }
  0x69   : > { %p4986_p13 = pnand %p4984_p11, %p4981_p7 }
  0x6b   : > { %4989 = shalt.err (!%p4986_p13)
}
  0x6c   : > { %s4990_s12 = scalar_lea.vmem %s479_s16, 128  ;;  %p6068_p10 = pmov %p6067_p0 }
  0x6d   : > { %p4991_p5 = scmp.ne.s32.totalorder %s479_s16, %s4990_s12  ;;  %p4998_p6 = scmp.lt.s32.totalorder %s479_s16, %s479_s16 }
  0x6e   : > { %p4999_p9 = scmp.lt.s32.totalorder %s4990_s12, %s4990_s12 }
  0x6f   : > { %p4993_p1 = pnand %p4991_p5, %p6068_p10 }
  0x70   : > { %p5000_p8 = por %p4999_p9, %p4998_p6 }
  0x71   : > { %p4994_p3 = pneg %p4993_p1 }
  0x73   : > { %p5001_p0 = pnand %p5000_p8, %p4994_p3 }
  0x75   : > { %5004 = shalt.err (!%p5001_p0)
}
  0x76   : > { %4723 = dma.hbm_to_vmem [thread:$0]  (!%p5309_p12), %s6066_s1, 128, %s479_s16, [#allocation6], %s5144_s27, %s5144_s27, %s5145_s14  }
  0x77   : > { %s6069_s18 = sshll.u32 %s5137_s24, 8  ;;  %s6070_s9 = sld [smem:[#allocation26_spill]] }
  0x78   : > { %s556_s20 = scalar_lea.vmem [#allocation8], %s5344_s2  ;;  %p6071_p9 = scmp.ne.s32.totalorder %s6062_s21, 0 }
  0x79   : > { %s563_s13 = sshll.u32 %s556_s20, 4  ;;  %s5422_s13 = int_to_ptr.vmem [resolvable:$true] %s563_s13 }
  0x7a   : > { %p6072_p2 = pneg %p6071_p9 }
  0x7d   : > { %s5419_s19 = scalar_lea.hbm %s6070_s9, %s6069_s18  ;;  %s5010_s12 = scalar_lea.hbm %s6070_s9, 512 }
  0x7e   : > { %s5005_s30 = scalar_lea.hbm %s5419_s19, 256  ;;  %p5011_p7 = scmp.lt.u32.totalorder %s5419_s19, %s6070_s9 }
  0x7f   : > { %p5006_p8 = scmp.ne.s32.totalorder %s5419_s19, %s5005_s30  ;;  %p5012_p11 = scmp.lt.u32.totalorder %s5010_s12, %s5005_s30 }
  0x80   : > { %p5014_p5 = scmp.lt.u32.totalorder %s5005_s30, %s5419_s19 }
  0x81   : > { %p5008_p4 = pnand %p5006_p8, %p6072_p2  ;;  %p5013_p13 = por %p5012_p11, %p5011_p7 }
  0x83   : > { %p5009_p12 = pneg %p5008_p4  ;;  %p5015_p10 = por %p5014_p5, %p5013_p13 }
  0x85   : > { %p5016_p1 = pnand %p5015_p10, %p5009_p12 }
  0x87   : > { %5019 = shalt.err (!%p5016_p1)
}
  0x88   : > { %s5020_s2 = scalar_lea.vmem %s5422_s13, 256  ;;  %p6073_p6 = pmov %p6072_p2 }
  0x89   : > { %p5021_p3 = scmp.ne.s32.totalorder %s5422_s13, %s5020_s2  ;;  %s5146_s18 = smov [#allocation8]  }
  0x8a   : > { %s5025_s11 = sshll.u32 %s5146_s18, 4  ;;  %s5026_s11 = int_to_ptr.vmem [resolvable:$false] %s5025_s11 }
  0x8b   : > { %p5023_p0 = pnand %p5021_p3, %p6073_p6  ;;  %s5027_s28 = scalar_lea.vmem %s5026_s11, 512 }
  0x8c   : > { %p5028_p2 = scmp.lt.s32.totalorder %s5422_s13, %s5026_s11  ;;  %p5029_p4 = scmp.lt.s32.totalorder %s5027_s28, %s5020_s2 }
  0x8d   : > { %p5024_p8 = pneg %p5023_p0 }
  0x8e   : > { %p5030_p7 = por %p5029_p4, %p5028_p2 }
  0x90   : > { %p5031_p11 = pnand %p5030_p7, %p5024_p8 }
  0x92   : > { %5034 = shalt.err (!%p5031_p11)
}
  0x93   : > { %4730 = dma.hbm_to_vmem [thread:$0]  (!%p6071_p9), %s5419_s19, 256, %s5422_s13, %s5359_s15, %s5144_s27, %s5144_s27, %s5145_s14  }
  0x94   : > { %p6074_p12 = scmp.ne.s32.totalorder %s6060_s17, 0 }
  0x95   : > { %p6075_p13 = scmp.eq.s32.totalorder (!%p6074_p12), %s5272_s25, 0 }
  0x96   : > { %607 = sbr.rel (%p6074_p12) target bundleno = 6051 (0x17a3), region = 80 }
  0x9d   : > { %5104 = dma.done.wait (%p6075_p13), [#allocation3], 256   ;;  %p6076_p5 = pmov %p6075_p13 }
  0x9f   : > { %5106 = vsyncadd (%p6076_p5), [#allocation3], 4294967040  ;;  %p6077_p10 = pmov %p6076_p5 }
  0xa0   : > { %p6078_p1 = pmov %p6076_p5 }
  0xa1   : > { %5108 = dma.done.wait (%p6077_p10), [#allocation6], 128  }
  0xa2   : > { %5110 = vsyncadd (%p6078_p1), [#allocation6], 4294967168  ;;  %s617_s21 = sand.u32 1, %s5272_s25   ;;  %s619_s15 = sand.u32 1, %s5129_s22  }
  0xa3   : > { %s5463_s27 = sshll.u32 %s619_s15, 4  ;;  %s618_s17 = scalar_lea.sflag [#allocation3], %s617_s21 }
  0xa4   : > { %p6079_p9 = scmp.ne.s32.totalorder %s6059_s0, 0 }
  0xa6   : > { %5112 = dma.done.wait (%p6079_p9), %s618_s17, 512  }
  0xa7   : > { %5114 = vsyncadd (%p6079_p9), %s618_s17, 4294966784  ;;  %p717_p3 = scmp.lt.s32.totalorder %s5272_s25, 1  ;;  %s6080_s3 = sld [smem:[#allocation22_spill]] }
  0xa8   : > { %s6081_s4 = sld [smem:[#allocation23_spill]]  ;;  %s6082_s5 = sld [smem:[#allocation24_spill]] }
  0xa9   : > { %s5472_s19 = scalar_select %p717_p3, %s5272_s25, 1 }
  0xaa   : > { %s6083_s1 = sld [smem:[#allocation27_spill]]  ;;  %s6086_s17 = sld [smem:[#allocation30_spill]] }
  0xab   : > { %s4389_s20 = sshll.u32 %s5472_s19, 4  ;;  %s740_s24 = scalar_lea.vmem %s6021_s10, %s5472_s19 }
  0xac   : > { %s4392_s16 = sshll.u32 %s5472_s19, 5  ;;  %s630_s13 = scalar_lea.vmem [#allocation8], %s5463_s27 }
  0xad   : > { %s5482_s12 = scalar_lea.vmem %s6080_s3, %s4389_s20  ;;  %p6087_p6 = scmp.ne.s32.totalorder %s5272_s25, 0 }
  0xae   : > { %s5487_s2 = scalar_lea.vmem %s6081_s4, %s4389_s20  ;;  %s5492_s28 = scalar_lea.vmem %s6082_s5, %s4389_s20  ;;  %v4799_v0 = vld [vmem:[#allocation5] sm:$0xff] (!%p6087_p6)   ;;  %v5147_v1 = vmov (!%p6087_p6), 0.0   ;;  %v760_v2 = vld [vmem:[#allocation2] sm:$0xff] (!%p6087_p6)  ;;  %v761_v3 = vld [vmem:[#allocation2 + $0x8] sm:$0xff] (!%p6087_p6)  ;;  %vm5148_vm0 = vmmov (!%p6087_p6), 0   ;;  %vm778_vm1 = vcmask (!%p6087_p6), 130048  }
  0xaf   : > { %s6084_s4 = sld [smem:[#allocation28_spill]]  ;;  %s6085_s5 = sld [smem:[#allocation29_spill]]  ;;  %4479 = vmatprep.subr.bf16.mxu0 (!%p6087_p6), %v5147_v1  ;;  %4481 = vmatprep.mubr.msk.bf16.mxu0 (!%p6087_p6), %vm5148_vm0, %v5147_v1  ;;  %v762_v4 = vpack.c.bf16 (!%p6087_p6), %v761_v3, %v760_v2  ;;  %vm823_vm2 = vcmask (!%p6087_p6), 261120  }
  0xb0   : > { %s5506_s6 = scalar_lea.vmem %s6083_s1, %s4392_s16  ;;  %s754_s29 = scalar_lea.vmem %s6086_s17, %s5472_s19  ;;  %4480 = vmatpush3.bf16.msra.mxu0 (!%p6087_p6), %v4799_v0 }
  0xb1   : > { %759 = sbr.rel (%p6087_p6) target bundleno = 396 (0x18c), region = 100 }
  0xb3   : > { %4482 = vmatmul.mubr.msk.bf16.vlgmr.msra.gmra.mrb[0].mxu0 (!%p6087_p6), %vm778_vm1, %v762_v4 }
  0xb5   : > { %s748_s18 = scalar_lea.vmem %s6084_s4, %s5472_s19  ;;  %s751_s9 = scalar_lea.vmem %s6085_s5, %s5472_s19 }
  0xb6   : > { %s6088_s4 = sld [smem:[#allocation21_spill]] (!%p6087_p6) }
  0xbc   : > { %v4303_v5 = vld [vmem:[%s6088_s4] ss:$0 sm:$0xff] }
 0x186   : > { %v816_v6 = vpop.f32.mrb[0].mxu0 }
 0x187   : > { %v817_v7 = vadd.f32 %v4303_v5, %v816_v6  ;;  %v4483_v8 = vpop.f32.mrb[1].mxu0 }
 0x188   : > { %v819_v9 = vpop.f32.mrb[2].mxu0 }
 0x189   : > { %824 = vst.msk [vmem:[#allocation9] sm:$0xff] %vm823_vm2, %v817_v7  ;;  %v820_v10 = vadd.f32 %v4303_v5, %v819_v9  ;;  %v4484_v11 = vpop.f32.mrb[3].mxu0 }
 0x18b   : > { %825 = vst.msk [vmem:[#allocation9 + $0x8] sm:$0xff] %vm823_vm2, %v820_v10 }
 0x18c PF: > { %v4835_v12 = vld [vmem:[%s5482_s12] sm:$0xff]   ;;  %v5149_v13 = vmov 0.0   ;;  %v4836_v14 = vld [vmem:[%s5482_s12 + $0x8] sm:$0xff]   ;;  %vm5150_vm3 = vmmov 0   ;;  %vm845_vm4 = vcmask 261120   ;;  %vm1004_vm5 = vcmask 31744   ;;  %s6091_s4 = scalar_lea.vmem %s6018_s7, %s5472_s19 }
 0x18d   : > { %4485 = vmatprep.subr.bf16.mxu1 %v5149_v13  ;;  %4501 = vmatprep.subr.bf16.mxu0 %v5149_v13  ;;  %v4837_v17 = vld [vmem:[%s5487_s2] sm:$0xff]   ;;  %v4838_v19 = vld [vmem:[%s5487_s2 + $0x8] sm:$0xff]   ;;  %s5151_s5 = smov 124   ;;  %vm1157_vm6 = vcmask 64512   ;;  %s5152_s14 = smov 120   ;;  %vm3698_vm7 = vcmask 97280  }
 0x18e   : > { %4486 = vmatpush3.bf16.msra.mxu1 %v4835_v12  ;;  %4489 = vmatprep.mubr.msk.bf16.mxu1 %vm5150_vm3, %v5149_v13  ;;  %v4839_v28 = vld [vmem:[%s5492_s28] sm:$0xff]   ;;  %v4840_v29 = vld [vmem:[%s5492_s28 + $0x8] sm:$0xff]   ;;  %s5153_s0 = smov 116   ;;  %s5154_s12 = smov 112   ;;  %vm3701_vm8 = vcmask 130048   ;;  %vm3704_vm9 = vcmask 162816  }
 0x18f   : > { %4487 = vmatprep.subr.bf16.mxu1 %v5149_v13  ;;  %4505 = vmatprep.mubr.msk.bf16.mxu0 %vm5150_vm3, %v5149_v13  ;;  %s5155_s2 = smov 108   ;;  %s5156_s28 = smov 104   ;;  %vm3707_vm10 = vcmask 195584   ;;  %vm3710_vm11 = vcmask 228352   ;;  %vm3933_vm12 = vcmask 523264  }
 0x190   : > { %v826_v15 = vld [vmem:[#allocation9] sm:$0xff]  ;;  %4502 = vmatpush3.bf16.msra.mxu0 %v4839_v28  ;;  %s5157_s17 = smov 100   ;;  %s5158_s30 = smov 4  }
 0x191   : > { %4503 = vmatprep.subr.bf16.mxu0 %v5149_v13  ;;  %s5159_s16 = smov 8   ;;  %s5160_s26 = smov 16  }
 0x192   : > { %v827_v16 = vld [vmem:[#allocation9 + $0x8] sm:$0xff]  ;;  %4488 = vmatpush3.bf16.msra.mxu1 %v4836_v14  ;;  %s5161_s20 = smov 24   ;;  %s5162_s11 = smov 12  }
 0x193   : > { %v828_v18 = vpack.c.bf16 %v827_v16, %v826_v15  ;;  %4493 = vmatprep.subr.bf16.mxu1 %v5149_v13  ;;  %s5163_s21 = smov 20   ;;  %s6089_s15 = scalar_lea.vmem [#allocation7], %s5463_s27 }
 0x194   : > { %4504 = vmatpush3.bf16.msra.mxu0 %v4840_v29  ;;  %s6090_s1 = smov %s6089_s15  ;;  %s5164_s3 = smov 28  }
 0x195   : > { %4490 = vmatmul.mubr.msk.bf16.vlgmr.msra.gmra.mrb[0].mxu1 %vm845_vm4, %v828_v18  ;;  %4519 = vmatprep.subr.mxu0 %v5149_v13  ;;  %p4380_p0 = scmp.ne.s32.totalorder %s5272_s25, 1 }
 0x196   : > { %4494 = vmatpush3.bf16.msra.mxu1 %v4837_v17  ;;  %4497 = vmatprep.mubr.msk.bf16.mxu1 %vm5150_vm3, %v5149_v13  ;;  %vm4051_vm13 = vcmask (!%p4380_p0), 1041409   ;;  %vm4054_vm14 = vcmask (!%p4380_p0), 254976  }
 0x197   : > { %4495 = vmatprep.subr.bf16.mxu1 %v5149_v13  ;;  %4506 = vmatmul.mubr.msk.bf16.vlgmr.msra.gmra.mrb[0].mxu0 %vm845_vm4, %v828_v18 }
 0x198   : > { %4521 = vmatprep.mubr.msk.f32.mxu0 %vm5150_vm3, %v5149_v13 }
 0x19a   : > { %4496 = vmatpush3.bf16.msra.mxu1 %v4838_v19 }
 0x19b   : > { %4509 = vmatprep.subr.mxu1 %v5149_v13 }
 0x19d   : > { %4498 = vmatmul.mubr.msk.bf16.vlgmr.msra.gmra.mrb[4].mxu1 %vm845_vm4, %v828_v18 }
 0x19e   : > { %4511 = vmatprep.mubr.msk.f32.mxu1 %vm5150_vm3, %v5149_v13 }
 0x268   : > { %v5546_v20 = vpop.f32.mrb[0].mxu1 }
 0x269   : > { %v4491_v21 = vpop.f32.mrb[1].mxu1 }
 0x26a   : > { %v5548_v22 = vpop.f32.mrb[2].mxu1  ;;  %v5585_v46 = vpop.f32.mrb[0].mxu0 }
 0x26b   : > { %v4492_v23 = vpop.f32.mrb[3].mxu1  ;;  %4520 = vmatpush3.msra.mxu0 %v5585_v46  ;;  %v4507_v47 = vpop.f32.mrb[1].mxu0 }
 0x26c   : > { %v5588_v48 = vpop.f32.mrb[2].mxu0  ;;  %4529 = vmatprep.subr.mxu0 %v5149_v13 }
 0x26d   : > { %v4508_v49 = vpop.f32.mrb[3].mxu0 }
 0x270   : > { %v5550_v24 = vpop.f32.mrb[4].mxu1 }
 0x271   : > { %v4499_v25 = vpop.f32.mrb[5].mxu1  ;;  %4510 = vmatpush3.xpose.msk.msra.mxu1 %vm1004_vm5, %v5550_v24 }
 0x272   : > { %v5554_v26 = vpop.f32.mrb[6].mxu1  ;;  %4514 = vmatprep.subr.mxu1 %v5149_v13 }
 0x273   : > { %1406 = vrot.lane.b32.xlu1 %v5554_v26, %s5151_s5  ;;  %v4500_v27 = vpop.f32.mrb[7].mxu1 }
 0x274   : > { %4512 = vmatmul.mubr.msk.f32.vlgmr.msra.gmra.mrb[8].mxu1 %vm1004_vm5, %v5546_v20 }
 0x275   : > { %4515 = vmatpush3.xpose.msk.msra.mxu1 %vm1004_vm5, %v5554_v26  ;;  %4516 = vmatprep.mubr.msk.f32.mxu1 %vm5150_vm3, %v5149_v13 }
 0x276   : > { %4524 = vmatprep.subr.mxu1 %v5149_v13 }
 0x277   : > { %1326 = vrot.lane.b32.xlu1 %v5546_v20, %s5151_s5 }
 0x278   : > { %4517 = vmatmul.mubr.msk.f32.vlgmr.msra.gmra.mrb[10].mxu1 %vm1004_vm5, %v5548_v22 }
 0x279   : > { %4526 = vmatprep.mubr.msk.f32.mxu1 %vm5150_vm3, %v5149_v13  ;;  %4525 = vmatpush3.msra.mxu1 %v5588_v48 }
 0x27a   : > { %4534 = vmatprep.subr.mxu1 %v5149_v13 }
 0x2e5   : > { %v1407_v50 = vpop.permute.xlu1 %1406 }
 0x2e9   : > { %v1327_v51 = vpop.permute.xlu1 %1326 }
 0x347   : > { %v1077_v30 = vpop.f32.mrb[8].mxu1 }
 0x348   : > { %v4513_v31 = vpop.f32.mrb[9].mxu1  ;;  %v1158_v32 = vsel %vm1157_vm6, %v1077_v30, -inf }
 0x349   : > { %1159 = vmax.xlane.f32.xlu0 %v1158_v32 }
 0x34b   : > { %v1153_v33 = vpop.f32.mrb[10].mxu1 }
 0x34c   : > { %v4518_v34 = vpop.f32.mrb[11].mxu1  ;;  %v1161_v35 = vsel %vm1157_vm6, %v1153_v33, -inf }
 0x34d   : > { %1162 = vmax.xlane.f32.xlu0 %v1161_v35 }
 0x363   : > { %1328 = vrot.lane.b32.xlu0 %v5550_v24, %s5151_s5 }
 0x3d6   : > { %v1160_v36 = vpop.xlane.xlu0 %1159 }
 0x3d7   : > { %v1164_v37 = vsub.f32 %v1077_v30, %v1160_v36 }
 0x3d9   : > { %v1166_v38 = vmul.f32 1.442695, %v1164_v37 }
 0x3da   : > { %v1163_v39 = vpop.xlane.xlu0 %1162 }
 0x3db   : > { %4849 = vpow2.f32 %v1166_v38  ;;  %v1165_v40 = vsub.f32 %v1153_v33, %v1163_v39 }
 0x3dd   : > { %v1168_v41 = vmul.f32 1.442695, %v1165_v40 }
 0x3de   : > { %v1329_v56 = vpop.permute.xlu0 %1328 }
 0x3df   : > { %4851 = vpow2.f32 %v1168_v41 }
 0x3e5   : > { %v4850_v42 = vpop.eup %4849 }
 0x3e6   : > { %v1170_v43 = vsel %vm1157_vm6, %v4850_v42, 0.0 }
 0x3e7   : > { %1171 = vadd.xlane.f32.xlu1 %v1170_v43 }
 0x3e9   : > { %v4852_v44 = vpop.eup %4851 }
 0x3ea   : > { %v1173_v45 = vsel %vm1157_vm6, %v4852_v44, 0.0 }
 0x3eb   : > { %1174 = vadd.xlane.f32.xlu1 %v1173_v45 }
 0x3fc   : > { %1404 = vrot.lane.b32.xlu1 %v5548_v22, %s5151_s5 }
 0x474   : > { %v1172_v52 = vpop.xlane.xlu1 %1171 }
 0x475   : > { %4853 = vrcp.f32 %v1172_v52 }
 0x478   : > { %v1175_v53 = vpop.xlane.xlu1 %1174 }
 0x479   : > { %4855 = vrcp.f32 %v1175_v53 }
 0x47c   : > { %v1405_v59 = vpop.permute.xlu1 %1404 }
 0x47f   : > { %v4854_v54 = vpop.eup %4853 }
 0x480   : > { %v1178_v55 = vmul.f32 %v4854_v54, %v4850_v42 }
 0x482   : > { %4522 = vmatmul.mubr.msk.f32.vlgmr.msra.gmra.mrb[4].mxu0 %vm1157_vm6, %v1178_v55 }
 0x483   : > { %v4856_v57 = vpop.eup %4855  ;;  %4530 = vmatpush3.xpose.msk.msra.mxu0 %vm1004_vm5, %v1329_v56  ;;  %4531 = vmatprep.mubr.msk.f32.mxu0 %vm5150_vm3, %v5149_v13 }
 0x484   : > { %v1179_v58 = vmul.f32 %v4856_v57, %v4852_v44  ;;  %4539 = vmatprep.subr.mxu0 %v5149_v13 }
 0x486   : > { %4527 = vmatmul.mubr.msk.f32.vlgmr.msra.gmra.mrb[12].mxu1 %vm1157_vm6, %v1179_v58  ;;  %4532 = vmatmul.mubr.msk.f32.vlgmr.msra.gmra.mrb[6].mxu0 %vm1004_vm5, %v1327_v51 }
 0x487   : > { %4535 = vmatpush3.xpose.msk.msra.mxu1 %vm1004_vm5, %v1407_v50  ;;  %4536 = vmatprep.mubr.msk.f32.mxu1 %vm5150_vm3, %v5149_v13 }
 0x488   : > { %4544 = vmatprep.subr.mxu1 %v5149_v13  ;;  %4541 = vmatprep.mubr.msk.f32.mxu0 %vm5150_vm3, %v5149_v13 }
 0x48a   : > { %4537 = vmatmul.mubr.msk.f32.vlgmr.msra.gmra.mrb[14].mxu1 %vm1004_vm5, %v1405_v59 }
 0x48b   : > { %4546 = vmatprep.mubr.msk.f32.mxu1 %vm5150_vm3, %v5149_v13 }
 0x555   : > { %v5611_v60 = vpop.f32.mrb[4].mxu0 }
 0x556   : > { %v4523_v61 = vpop.f32.mrb[5].mxu0 }
 0x559   : > { %v5613_v62 = vpop.f32.mrb[12].mxu1  ;;  %v1400_v63 = vpop.f32.mrb[6].mxu0 }
 0x55a   : > { %v4528_v0 = vpop.f32.mrb[13].mxu1  ;;  %v4533_v1 = vpop.f32.mrb[7].mxu0  ;;  %v1482_v2 = vsel %vm1157_vm6, %v1400_v63, -inf }
 0x55b   : > { %1483 = vmax.xlane.f32.xlu0 %v1482_v2 }
 0x55d   : > { %v1478_v3 = vpop.f32.mrb[14].mxu1 }
 0x55e   : > { %v4538_v4 = vpop.f32.mrb[15].mxu1  ;;  %v1485_v5 = vsel %vm1157_vm6, %v1478_v3, -inf }
 0x55f   : > { %1486 = vmax.xlane.f32.xlu1 %v1485_v5 }
 0x570   : > { %1582 = vrot.lane.b32.xlu1 %v5588_v48, %s5151_s5 }
 0x571   : > { %1505 = vrot.lane.b32.xlu0 %v5585_v46, %s5151_s5 }
 0x574   : > { %1660 = vrot.lane.b32.xlu1 %v5550_v24, %s5152_s14 }
 0x578   : > { %1738 = vrot.lane.b32.xlu1 %v5554_v26, %s5152_s14 }
 0x57c   : > { %1736 = vrot.lane.b32.xlu1 %v5548_v22, %s5152_s14 }
 0x5e8   : > { %v1484_v6 = vpop.xlane.xlu0 %1483 }
 0x5e9   : > { %v1488_v7 = vsub.f32 %v1400_v63, %v1484_v6 }
 0x5eb   : > { %v1490_v8 = vmul.f32 1.442695, %v1488_v7 }
 0x5ec   : > { %v1506_v9 = vpop.permute.xlu0 %1505  ;;  %v1487_v10 = vpop.xlane.xlu1 %1486 }
 0x5ed   : > { %4857 = vpow2.f32 %v1490_v8  ;;  %v1489_v11 = vsub.f32 %v1478_v3, %v1487_v10  ;;  %4540 = vmatpush3.msra.mxu0 %v1506_v9 }
 0x5ee   : > { %4549 = vmatprep.subr.mxu0 %v5149_v13 }
 0x5ef   : > { %v1492_v12 = vmul.f32 1.442695, %v1489_v11 }
 0x5f0   : > { %v1583_v14 = vpop.permute.xlu1 %1582 }
 0x5f1   : > { %4859 = vpow2.f32 %v1492_v12  ;;  %4545 = vmatpush3.msra.mxu1 %v1583_v14 }
 0x5f2   : > { %4554 = vmatprep.subr.mxu1 %v5149_v13 }
 0x5f4   : > { %v1661_v23 = vpop.permute.xlu1 %1660 }
 0x5f7   : > { %v4858_v15 = vpop.eup %4857 }
 0x5f8   : > { %v1494_v16 = vsel %vm1157_vm6, %v4858_v15, 0.0  ;;  %v1739_v29 = vpop.permute.xlu1 %1738 }
 0x5f9   : > { %1495 = vadd.xlane.f32.xlu0 %v1494_v16 }
 0x5fb   : > { %v4860_v17 = vpop.eup %4859 }
 0x5fc   : > { %v1497_v18 = vsel %vm1157_vm6, %v4860_v17, 0.0  ;;  %v1737_v32 = vpop.permute.xlu1 %1736 }
 0x5fd   : > { %1498 = vadd.xlane.f32.xlu0 %v1497_v18 }
 0x613   : > { %1658 = vrot.lane.b32.xlu0 %v5546_v20, %s5152_s14 }
 0x686   : > { %v1496_v19 = vpop.xlane.xlu0 %1495 }
 0x687   : > { %4861 = vrcp.f32 %v1496_v19 }
 0x68a   : > { %v1499_v21 = vpop.xlane.xlu0 %1498 }
 0x68b   : > { %4863 = vrcp.f32 %v1499_v21 }
 0x68e   : > { %v1659_v31 = vpop.permute.xlu0 %1658 }
 0x691   : > { %v4862_v25 = vpop.eup %4861 }
 0x692   : > { %v1502_v27 = vmul.f32 %v4862_v25, %v4858_v15 }
 0x694   : > { %4542 = vmatmul.mubr.msk.f32.vlgmr.msra.gmra.mrb[8].mxu0 %vm1157_vm6, %v1502_v27 }
 0x695   : > { %v4864_v28 = vpop.eup %4863  ;;  %4550 = vmatpush3.xpose.msk.msra.mxu0 %vm1004_vm5, %v1661_v23  ;;  %4551 = vmatprep.mubr.msk.f32.mxu0 %vm5150_vm3, %v5149_v13 }
 0x696   : > { %v1503_v30 = vmul.f32 %v4864_v28, %v4860_v17  ;;  %4559 = vmatprep.subr.mxu0 %v5149_v13 }
 0x698   : > { %4547 = vmatmul.mubr.msk.f32.vlgmr.msra.gmra.mrb[16].mxu1 %vm1157_vm6, %v1503_v30  ;;  %4552 = vmatmul.mubr.msk.f32.vlgmr.msra.gmra.mrb[10].mxu0 %vm1004_vm5, %v1659_v31 }
 0x699   : > { %4555 = vmatpush3.xpose.msk.msra.mxu1 %vm1004_vm5, %v1739_v29  ;;  %4556 = vmatprep.mubr.msk.f32.mxu1 %vm5150_vm3, %v5149_v13 }
 0x69a   : > { %4564 = vmatprep.subr.mxu1 %v5149_v13  ;;  %4561 = vmatprep.mubr.msk.f32.mxu0 %vm5150_vm3, %v5149_v13 }
 0x69c   : > { %4557 = vmatmul.mubr.msk.f32.vlgmr.msra.gmra.mrb[18].mxu1 %vm1004_vm5, %v1737_v32 }
 0x69d   : > { %4566 = vmatprep.mubr.msk.f32.mxu1 %vm5150_vm3, %v5149_v13 }
 0x767   : > { %v5649_v33 = vpop.f32.mrb[8].mxu0 }
 0x768   : > { %v4543_v34 = vpop.f32.mrb[9].mxu0 }
 0x76b   : > { %v5651_v35 = vpop.f32.mrb[16].mxu1  ;;  %v1732_v36 = vpop.f32.mrb[10].mxu0 }
 0x76c   : > { %v4800_v37 = vpack.i.bf16 %v5651_v35, %v5649_v33  ;;  %v4548_v38 = vpop.f32.mrb[17].mxu1  ;;  %v4553_v39 = vpop.f32.mrb[11].mxu0  ;;  %v1814_v40 = vsel %vm1157_vm6, %v1732_v36, -inf }
 0x76d   : > { %1815 = vmax.xlane.f32.xlu0 %v1814_v40 }
 0x76f   : > { %v1810_v41 = vpop.f32.mrb[18].mxu1 }
 0x770   : > { %v4558_v42 = vpop.f32.mrb[19].mxu1  ;;  %v1817_v43 = vsel %vm1157_vm6, %v1810_v41, -inf }
 0x771   : > { %1818 = vmax.xlane.f32.xlu1 %v1817_v43 }
 0x782   : > { %1912 = vrot.lane.b32.xlu1 %v5588_v48, %s5152_s14 }
 0x783   : > { %1836 = vrot.lane.b32.xlu0 %v5585_v46, %s5152_s14 }
 0x786   : > { %1990 = vrot.lane.b32.xlu1 %v5550_v24, %s5153_s0 }
 0x78a   : > { %2068 = vrot.lane.b32.xlu1 %v5554_v26, %s5153_s0 }
 0x78e   : > { %2066 = vrot.lane.b32.xlu1 %v5548_v22, %s5153_s0 }
 0x7fa   : > { %v1816_v44 = vpop.xlane.xlu0 %1815 }
 0x7fb   : > { %v1820_v45 = vsub.f32 %v1732_v36, %v1816_v44 }
 0x7fd   : > { %v1822_v47 = vmul.f32 1.442695, %v1820_v45 }
 0x7fe   : > { %v1837_v49 = vpop.permute.xlu0 %1836  ;;  %v1819_v50 = vpop.xlane.xlu1 %1818 }
 0x7ff   : > { %4865 = vpow2.f32 %v1822_v47  ;;  %v1821_v51 = vsub.f32 %v1810_v41, %v1819_v50  ;;  %4560 = vmatpush3.msra.mxu0 %v1837_v49 }
 0x800   : > { %4569 = vmatprep.subr.mxu0 %v5149_v13 }
 0x801   : > { %v1824_v52 = vmul.f32 1.442695, %v1821_v51 }
 0x802   : > { %v1913_v53 = vpop.permute.xlu1 %1912 }
 0x803   : > { %4867 = vpow2.f32 %v1824_v52  ;;  %4565 = vmatpush3.msra.mxu1 %v1913_v53 }
 0x804   : > { %4574 = vmatprep.subr.mxu1 %v5149_v13 }
 0x806   : > { %v1991_v61 = vpop.permute.xlu1 %1990 }
 0x809   : > { %v4866_v54 = vpop.eup %4865 }
 0x80a   : > { %v1826_v55 = vsel %vm1157_vm6, %v4866_v54, 0.0  ;;  %v2069_v2 = vpop.permute.xlu1 %2068 }
 0x80b   : > { %1827 = vadd.xlane.f32.xlu0 %v1826_v55 }
 0x80d   : > { %v4868_v56 = vpop.eup %4867 }
 0x80e   : > { %v1829_v57 = vsel %vm1157_vm6, %v4868_v56, 0.0  ;;  %v2067_v5 = vpop.permute.xlu1 %2066 }
 0x80f   : > { %1830 = vadd.xlane.f32.xlu0 %v1829_v57 }
 0x825   : > { %1988 = vrot.lane.b32.xlu0 %v5546_v20, %s5153_s0 }
 0x898   : > { %v1828_v58 = vpop.xlane.xlu0 %1827 }
 0x899   : > { %4869 = vrcp.f32 %v1828_v58 }
 0x89c   : > { %v1831_v59 = vpop.xlane.xlu0 %1830 }
 0x89d   : > { %4871 = vrcp.f32 %v1831_v59 }
 0x8a0   : > { %v1989_v4 = vpop.permute.xlu0 %1988 }
 0x8a3   : > { %v4870_v63 = vpop.eup %4869 }
 0x8a4   : > { %v1834_v0 = vmul.f32 %v4870_v63, %v4866_v54 }
 0x8a6   : > { %4562 = vmatmul.mubr.msk.f32.vlgmr.msra.gmra.mrb[12].mxu0 %vm1157_vm6, %v1834_v0 }
 0x8a7   : > { %v4872_v1 = vpop.eup %4871  ;;  %4570 = vmatpush3.xpose.msk.msra.mxu0 %vm1004_vm5, %v1991_v61  ;;  %4571 = vmatprep.mubr.msk.f32.mxu0 %vm5150_vm3, %v5149_v13 }
 0x8a8   : > { %v1835_v3 = vmul.f32 %v4872_v1, %v4868_v56  ;;  %4579 = vmatprep.subr.mxu0 %v5149_v13 }
 0x8aa   : > { %4567 = vmatmul.mubr.msk.f32.vlgmr.msra.gmra.mrb[20].mxu1 %vm1157_vm6, %v1835_v3  ;;  %4572 = vmatmul.mubr.msk.f32.vlgmr.msra.gmra.mrb[14].mxu0 %vm1004_vm5, %v1989_v4 }
 0x8ab   : > { %4575 = vmatpush3.xpose.msk.msra.mxu1 %vm1004_vm5, %v2069_v2  ;;  %4576 = vmatprep.mubr.msk.f32.mxu1 %vm5150_vm3, %v5149_v13 }
 0x8ac   : > { %4584 = vmatprep.subr.mxu1 %v5149_v13  ;;  %4581 = vmatprep.mubr.msk.f32.mxu0 %vm5150_vm3, %v5149_v13 }
 0x8ae   : > { %4577 = vmatmul.mubr.msk.f32.vlgmr.msra.gmra.mrb[22].mxu1 %vm1004_vm5, %v2067_v5 }
 0x8af   : > { %4586 = vmatprep.mubr.msk.f32.mxu1 %vm5150_vm3, %v5149_v13 }
 0x979   : > { %v5689_v6 = vpop.f32.mrb[12].mxu0 }
 0x97a   : > { %v4563_v7 = vpop.f32.mrb[13].mxu0 }
 0x97d   : > { %v5691_v8 = vpop.f32.mrb[20].mxu1  ;;  %v2062_v9 = vpop.f32.mrb[14].mxu0 }
 0x97e   : > { %v4805_v10 = vpack.i.bf16 %v5691_v8, %v5689_v6  ;;  %v4568_v11 = vpop.f32.mrb[21].mxu1  ;;  %v4573_v12 = vpop.f32.mrb[15].mxu0  ;;  %v2144_v14 = vsel %vm1157_vm6, %v2062_v9, -inf }
 0x97f   : > { %2145 = vmax.xlane.f32.xlu0 %v2144_v14 }
 0x981   : > { %v2140_v15 = vpop.f32.mrb[22].mxu1 }
 0x982   : > { %v4578_v16 = vpop.f32.mrb[23].mxu1  ;;  %v2147_v17 = vsel %vm1157_vm6, %v2140_v15, -inf }
 0x983   : > { %2148 = vmax.xlane.f32.xlu1 %v2147_v17 }
 0x994   : > { %2242 = vrot.lane.b32.xlu1 %v5588_v48, %s5153_s0 }
 0x995   : > { %2166 = vrot.lane.b32.xlu0 %v5585_v46, %s5153_s0  ;;  %s6092_s0 = scalar_lea.vmem %s6019_s8, %s5472_s19 }
 0x998   : > { %2320 = vrot.lane.b32.xlu1 %v5550_v24, %s5154_s12 }
 0x99c   : > { %2398 = vrot.lane.b32.xlu1 %v5554_v26, %s5154_s12 }
 0x9a0   : > { %2396 = vrot.lane.b32.xlu1 %v5548_v22, %s5154_s12 }
 0xa0c   : > { %v2146_v18 = vpop.xlane.xlu0 %2145 }
 0xa0d   : > { %v2150_v19 = vsub.f32 %v2062_v9, %v2146_v18 }
 0xa0f   : > { %v2152_v21 = vmul.f32 1.442695, %v2150_v19 }
 0xa10   : > { %v2167_v23 = vpop.permute.xlu0 %2166  ;;  %v2149_v25 = vpop.xlane.xlu1 %2148 }
 0xa11   : > { %4873 = vpow2.f32 %v2152_v21  ;;  %v2151_v27 = vsub.f32 %v2140_v15, %v2149_v25  ;;  %4580 = vmatpush3.msra.mxu0 %v2167_v23 }
 0xa12   : > { %4589 = vmatprep.subr.mxu0 %v5149_v13 }
 0xa13   : > { %v2154_v28 = vmul.f32 1.442695, %v2151_v27 }
 0xa14   : > { %v2243_v29 = vpop.permute.xlu1 %2242 }
 0xa15   : > { %4875 = vpow2.f32 %v2154_v28  ;;  %4585 = vmatpush3.msra.mxu1 %v2243_v29 }
 0xa16   : > { %4594 = vmatprep.subr.mxu1 %v5149_v13 }
 0xa18   : > { %v2321_v39 = vpop.permute.xlu1 %2320 }
 0xa1b   : > { %v4874_v30 = vpop.eup %4873 }
 0xa1c   : > { %v2156_v31 = vsel %vm1157_vm6, %v4874_v30, 0.0  ;;  %v2399_v43 = vpop.permute.xlu1 %2398 }
 0xa1d   : > { %2157 = vadd.xlane.f32.xlu0 %v2156_v31 }
 0xa1f   : > { %v4876_v32 = vpop.eup %4875 }
 0xa20   : > { %v2159_v34 = vsel %vm1157_vm6, %v4876_v32, 0.0  ;;  %v2397_v47 = vpop.permute.xlu1 %2396 }
 0xa21   : > { %2160 = vadd.xlane.f32.xlu0 %v2159_v34 }
 0xa37   : > { %2318 = vrot.lane.b32.xlu0 %v5546_v20, %s5154_s12 }
 0xaaa   : > { %v2158_v36 = vpop.xlane.xlu0 %2157 }
 0xaab   : > { %4877 = vrcp.f32 %v2158_v36 }
 0xaae   : > { %v2161_v38 = vpop.xlane.xlu0 %2160 }
 0xaaf   : > { %4879 = vrcp.f32 %v2161_v38 }
 0xab2   : > { %v2319_v45 = vpop.permute.xlu0 %2318 }
 0xab5   : > { %v4878_v40 = vpop.eup %4877 }
 0xab6   : > { %v2164_v41 = vmul.f32 %v4878_v40, %v4874_v30 }
 0xab8   : > { %4582 = vmatmul.mubr.msk.f32.vlgmr.msra.gmra.mrb[16].mxu0 %vm1157_vm6, %v2164_v41 }
 0xab9   : > { %v4880_v42 = vpop.eup %4879  ;;  %4590 = vmatpush3.xpose.msk.msra.mxu0 %vm1004_vm5, %v2321_v39  ;;  %4591 = vmatprep.mubr.msk.f32.mxu0 %vm5150_vm3, %v5149_v13 }
 0xaba   : > { %v2165_v44 = vmul.f32 %v4880_v42, %v4876_v32  ;;  %4599 = vmatprep.subr.mxu0 %v5149_v13 }
 0xabc   : > { %4587 = vmatmul.mubr.msk.f32.vlgmr.msra.gmra.mrb[24].mxu1 %vm1157_vm6, %v2165_v44  ;;  %4592 = vmatmul.mubr.msk.f32.vlgmr.msra.gmra.mrb[18].mxu0 %vm1004_vm5, %v2319_v45 }
 0xabd   : > { %4595 = vmatpush3.xpose.msk.msra.mxu1 %vm1004_vm5, %v2399_v43  ;;  %4596 = vmatprep.mubr.msk.f32.mxu1 %vm5150_vm3, %v5149_v13 }
 0xabe   : > { %4604 = vmatprep.subr.mxu1 %v5149_v13  ;;  %4601 = vmatprep.mubr.msk.f32.mxu0 %vm5150_vm3, %v5149_v13 }
 0xac0   : > { %4597 = vmatmul.mubr.msk.f32.vlgmr.msra.gmra.mrb[26].mxu1 %vm1004_vm5, %v2397_v47 }
 0xac1   : > { %4606 = vmatprep.mubr.msk.f32.mxu1 %vm5150_vm3, %v5149_v13 }
 0xb8b   : > { %v5729_v49 = vpop.f32.mrb[16].mxu0 }
 0xb8c   : > { %v4583_v50 = vpop.f32.mrb[17].mxu0 }
 0xb8f   : > { %v5731_v51 = vpop.f32.mrb[24].mxu1  ;;  %v2392_v52 = vpop.f32.mrb[18].mxu0 }
 0xb90   : > { %v4810_v53 = vpack.i.bf16 %v5731_v51, %v5729_v49  ;;  %v4588_v54 = vpop.f32.mrb[25].mxu1  ;;  %v4593_v55 = vpop.f32.mrb[19].mxu0  ;;  %v2474_v56 = vsel %vm1157_vm6, %v2392_v52, -inf }
 0xb91   : > { %2475 = vmax.xlane.f32.xlu0 %v2474_v56 }
 0xb93   : > { %v2470_v57 = vpop.f32.mrb[26].mxu1 }
 0xb94   : > { %v4598_v58 = vpop.f32.mrb[27].mxu1  ;;  %v2477_v59 = vsel %vm1157_vm6, %v2470_v57, -inf }
 0xb95   : > { %2478 = vmax.xlane.f32.xlu1 %v2477_v59 }
 0xba6   : > { %2572 = vrot.lane.b32.xlu1 %v5588_v48, %s5154_s12 }
 0xba7   : > { %2496 = vrot.lane.b32.xlu0 %v5585_v46, %s5154_s12 }
 0xbaa   : > { %2650 = vrot.lane.b32.xlu1 %v5550_v24, %s5155_s2 }
 0xbae   : > { %2728 = vrot.lane.b32.xlu1 %v5554_v26, %s5155_s2 }
 0xbb2   : > { %2726 = vrot.lane.b32.xlu1 %v5548_v22, %s5155_s2 }
 0xc1e   : > { %v2476_v61 = vpop.xlane.xlu0 %2475 }
 0xc1f   : > { %v2480_v63 = vsub.f32 %v2392_v52, %v2476_v61 }
 0xc21   : > { %v2482_v0 = vmul.f32 1.442695, %v2480_v63 }
 0xc22   : > { %v2497_v1 = vpop.permute.xlu0 %2496  ;;  %v2479_v2 = vpop.xlane.xlu1 %2478 }
 0xc23   : > { %4881 = vpow2.f32 %v2482_v0  ;;  %v2481_v3 = vsub.f32 %v2470_v57, %v2479_v2  ;;  %4600 = vmatpush3.msra.mxu0 %v2497_v1 }
 0xc24   : > { %4609 = vmatprep.subr.mxu0 %v5149_v13 }
 0xc25   : > { %v2484_v4 = vmul.f32 1.442695, %v2481_v3 }
 0xc26   : > { %v2573_v5 = vpop.permute.xlu1 %2572 }
 0xc27   : > { %4883 = vpow2.f32 %v2484_v4  ;;  %4605 = vmatpush3.msra.mxu1 %v2573_v5 }
 0xc28   : > { %4614 = vmatprep.subr.mxu1 %v5149_v13 }
 0xc2a   : > { %v2651_v16 = vpop.permute.xlu1 %2650 }
 0xc2d   : > { %v4882_v7 = vpop.eup %4881 }
 0xc2e   : > { %v2486_v9 = vsel %vm1157_vm6, %v4882_v7, 0.0  ;;  %v2729_v21 = vpop.permute.xlu1 %2728 }
 0xc2f   : > { %2487 = vadd.xlane.f32.xlu0 %v2486_v9 }
 0xc31   : > { %v4884_v11 = vpop.eup %4883 }
 0xc32   : > { %v2489_v12 = vsel %vm1157_vm6, %v4884_v11, 0.0  ;;  %v2727_v27 = vpop.permute.xlu1 %2726 }
 0xc33   : > { %2490 = vadd.xlane.f32.xlu0 %v2489_v12 }
 0xc49   : > { %2648 = vrot.lane.b32.xlu0 %v5546_v20, %s5155_s2 }
 0xcbc   : > { %v2488_v14 = vpop.xlane.xlu0 %2487 }
 0xcbd   : > { %4885 = vrcp.f32 %v2488_v14 }
 0xcc0   : > { %v2491_v15 = vpop.xlane.xlu0 %2490 }
 0xcc1   : > { %4887 = vrcp.f32 %v2491_v15 }
 0xcc4   : > { %v2649_v25 = vpop.permute.xlu0 %2648 }
 0xcc7   : > { %v4886_v17 = vpop.eup %4885 }
 0xcc8   : > { %v2494_v18 = vmul.f32 %v4886_v17, %v4882_v7 }
 0xcca   : > { %4602 = vmatmul.mubr.msk.f32.vlgmr.msra.gmra.mrb[20].mxu0 %vm1157_vm6, %v2494_v18 }
 0xccb   : > { %v4888_v19 = vpop.eup %4887  ;;  %4610 = vmatpush3.xpose.msk.msra.mxu0 %vm1004_vm5, %v2651_v16  ;;  %4611 = vmatprep.mubr.msk.f32.mxu0 %vm5150_vm3, %v5149_v13 }
 0xccc   : > { %v2495_v23 = vmul.f32 %v4888_v19, %v4884_v11  ;;  %4619 = vmatprep.subr.mxu0 %v5149_v13 }
 0xcce   : > { %4607 = vmatmul.mubr.msk.f32.vlgmr.msra.gmra.mrb[28].mxu1 %vm1157_vm6, %v2495_v23  ;;  %4612 = vmatmul.mubr.msk.f32.vlgmr.msra.gmra.mrb[22].mxu0 %vm1004_vm5, %v2649_v25 }
 0xccf   : > { %4615 = vmatpush3.xpose.msk.msra.mxu1 %vm1004_vm5, %v2729_v21  ;;  %4616 = vmatprep.mubr.msk.f32.mxu1 %vm5150_vm3, %v5149_v13 }
 0xcd0   : > { %4624 = vmatprep.subr.mxu1 %v5149_v13  ;;  %4621 = vmatprep.mubr.msk.f32.mxu0 %vm5150_vm3, %v5149_v13 }
 0xcd2   : > { %4617 = vmatmul.mubr.msk.f32.vlgmr.msra.gmra.mrb[30].mxu1 %vm1004_vm5, %v2727_v27 }
 0xcd3   : > { %4626 = vmatprep.mubr.msk.f32.mxu1 %vm5150_vm3, %v5149_v13 }
 0xd9d   : > { %v5769_v28 = vpop.f32.mrb[20].mxu0 }
 0xd9e   : > { %v4603_v29 = vpop.f32.mrb[21].mxu0 }
 0xda1   : > { %v5771_v30 = vpop.f32.mrb[28].mxu1  ;;  %v2722_v31 = vpop.f32.mrb[22].mxu0 }
 0xda2   : > { %v4815_v32 = vpack.i.bf16 %v5771_v30, %v5769_v28  ;;  %v4608_v34 = vpop.f32.mrb[29].mxu1  ;;  %v4613_v36 = vpop.f32.mrb[23].mxu0  ;;  %v2804_v38 = vsel %vm1157_vm6, %v2722_v31, -inf }
 0xda3   : > { %2805 = vmax.xlane.f32.xlu0 %v2804_v38 }
 0xda5   : > { %v2800_v39 = vpop.f32.mrb[30].mxu1 }
 0xda6   : > { %v4618_v40 = vpop.f32.mrb[31].mxu1  ;;  %v2807_v41 = vsel %vm1157_vm6, %v2800_v39, -inf }
 0xda7   : > { %2808 = vmax.xlane.f32.xlu1 %v2807_v41 }
 0xdb8   : > { %2902 = vrot.lane.b32.xlu1 %v5588_v48, %s5155_s2 }
 0xdb9   : > { %2826 = vrot.lane.b32.xlu0 %v5585_v46, %s5155_s2 }
 0xdbc   : > { %2980 = vrot.lane.b32.xlu1 %v5550_v24, %s5156_s28 }
 0xdc0   : > { %3058 = vrot.lane.b32.xlu1 %v5554_v26, %s5156_s28 }
 0xdc4   : > { %3056 = vrot.lane.b32.xlu1 %v5548_v22, %s5156_s28 }
 0xe30   : > { %v2806_v42 = vpop.xlane.xlu0 %2805 }
 0xe31   : > { %v2810_v43 = vsub.f32 %v2722_v31, %v2806_v42 }
 0xe33   : > { %v2812_v44 = vmul.f32 1.442695, %v2810_v43 }
 0xe34   : > { %v2827_v45 = vpop.permute.xlu0 %2826  ;;  %v2809_v47 = vpop.xlane.xlu1 %2808 }
 0xe35   : > { %4889 = vpow2.f32 %v2812_v44  ;;  %v2811_v50 = vsub.f32 %v2800_v39, %v2809_v47  ;;  %4620 = vmatpush3.msra.mxu0 %v2827_v45 }
 0xe36   : > { %4629 = vmatprep.subr.mxu0 %v5149_v13 }
 0xe37   : > { %v2814_v52 = vmul.f32 1.442695, %v2811_v50 }
 0xe38   : > { %v2903_v54 = vpop.permute.xlu1 %2902 }
 0xe39   : > { %4891 = vpow2.f32 %v2814_v52  ;;  %4625 = vmatpush3.msra.mxu1 %v2903_v54 }
 0xe3a   : > { %4634 = vmatprep.subr.mxu1 %v5149_v13 }
 0xe3c   : > { %v2981_v63 = vpop.permute.xlu1 %2980 }
 0xe3f   : > { %v4890_v55 = vpop.eup %4889 }
 0xe40   : > { %v2816_v56 = vsel %vm1157_vm6, %v4890_v55, 0.0  ;;  %v3059_v3 = vpop.permute.xlu1 %3058 }
 0xe41   : > { %2817 = vadd.xlane.f32.xlu0 %v2816_v56 }
 0xe43   : > { %v4892_v57 = vpop.eup %4891 }
 0xe44   : > { %v2819_v58 = vsel %vm1157_vm6, %v4892_v57, 0.0  ;;  %v3057_v7 = vpop.permute.xlu1 %3056 }
 0xe45   : > { %2820 = vadd.xlane.f32.xlu0 %v2819_v58 }
 0xe5b   : > { %2978 = vrot.lane.b32.xlu0 %v5546_v20, %s5156_s28 }
 0xece   : > { %v2818_v59 = vpop.xlane.xlu0 %2817 }
 0xecf   : > { %4893 = vrcp.f32 %v2818_v59 }
 0xed2   : > { %v2821_v61 = vpop.xlane.xlu0 %2820 }
 0xed3   : > { %4895 = vrcp.f32 %v2821_v61 }
 0xed6   : > { %v2979_v5 = vpop.permute.xlu0 %2978 }
 0xed9   : > { %v4894_v0 = vpop.eup %4893 }
 0xeda   : > { %v2824_v1 = vmul.f32 %v4894_v0, %v4890_v55 }
 0xedc   : > { %4622 = vmatmul.mubr.msk.f32.vlgmr.msra.gmra.mrb[24].mxu0 %vm1157_vm6, %v2824_v1 }
 0xedd   : > { %v4896_v2 = vpop.eup %4895  ;;  %4630 = vmatpush3.xpose.msk.msra.mxu0 %vm1004_vm5, %v2981_v63  ;;  %4631 = vmatprep.mubr.msk.f32.mxu0 %vm5150_vm3, %v5149_v13 }
 0xede   : > { %v2825_v4 = vmul.f32 %v4896_v2, %v4892_v57  ;;  %4639 = vmatprep.subr.mxu0 %v5149_v13 }
 0xee0   : > { %4627 = vmatmul.mubr.msk.f32.vlgmr.msra.gmra.mrb[32].mxu1 %vm1157_vm6, %v2825_v4  ;;  %4632 = vmatmul.mubr.msk.f32.vlgmr.msra.gmra.mrb[26].mxu0 %vm1004_vm5, %v2979_v5 }
 0xee1   : > { %4635 = vmatpush3.xpose.msk.msra.mxu1 %vm1004_vm5, %v3059_v3  ;;  %4636 = vmatprep.mubr.msk.f32.mxu1 %vm5150_vm3, %v5149_v13 }
 0xee2   : > { %4644 = vmatprep.subr.mxu1 %v5149_v13  ;;  %4641 = vmatprep.mubr.msk.f32.mxu0 %vm5150_vm3, %v5149_v13 }
 0xee4   : > { %4637 = vmatmul.mubr.msk.f32.vlgmr.msra.gmra.mrb[34].mxu1 %vm1004_vm5, %v3057_v7 }
 0xee5   : > { %4646 = vmatprep.mubr.msk.f32.mxu1 %vm5150_vm3, %v5149_v13 }
 0xfaf   : > { %v5809_v9 = vpop.f32.mrb[24].mxu0 }
 0xfb0   : > { %v4623_v11 = vpop.f32.mrb[25].mxu0 }
 0xfb3   : > { %v5811_v12 = vpop.f32.mrb[32].mxu1  ;;  %v3052_v14 = vpop.f32.mrb[26].mxu0 }
 0xfb4   : > { %v4820_v15 = vpack.i.bf16 %v5811_v12, %v5809_v9  ;;  %v4628_v16 = vpop.f32.mrb[33].mxu1  ;;  %v4633_v17 = vpop.f32.mrb[27].mxu0  ;;  %v3134_v18 = vsel %vm1157_vm6, %v3052_v14, -inf  ;;  %v4842_v9 = vld [vmem:[%s6090_s1 + $0x8] sm:$0xff]  }
 0xfb5   : > { %3135 = vmax.xlane.f32.xlu0 %v3134_v18 }
 0xfb7   : > { %v3130_v19 = vpop.f32.mrb[34].mxu1 }
 0xfb8   : > { %v4638_v21 = vpop.f32.mrb[35].mxu1  ;;  %v3137_v23 = vsel %vm1157_vm6, %v3130_v19, -inf }
 0xfb9   : > { %3138 = vmax.xlane.f32.xlu1 %v3137_v23 }
 0xfca   : > { %3232 = vrot.lane.b32.xlu1 %v5588_v48, %s5156_s28 }
 0xfcb   : > { %3156 = vrot.lane.b32.xlu0 %v5585_v46, %s5156_s28 }
 0xfce   : > { %3310 = vrot.lane.b32.xlu1 %v5550_v24, %s5157_s17 }
 0xfd2   : > { %3388 = vrot.lane.b32.xlu1 %v5554_v26, %s5157_s17 }
 0xfd6   : > { %3386 = vrot.lane.b32.xlu1 %v5548_v22, %s5157_s17 }
0x1042   : > { %v3136_v25 = vpop.xlane.xlu0 %3135 }
0x1043   : > { %v3140_v27 = vsub.f32 %v3052_v14, %v3136_v25 }
0x1045   : > { %v3142_v29 = vmul.f32 1.442695, %v3140_v27 }
0x1046   : > { %v3157_v31 = vpop.permute.xlu0 %3156  ;;  %v3139_v34 = vpop.xlane.xlu1 %3138 }
0x1047   : > { %4897 = vpow2.f32 %v3142_v29  ;;  %v3141_v36 = vsub.f32 %v3130_v19, %v3139_v34  ;;  %4640 = vmatpush3.msra.mxu0 %v3157_v31 }
0x1048   : > { %4649 = vmatprep.subr.mxu0 %v5149_v13 }
0x1049   : > { %v3144_v38 = vmul.f32 1.442695, %v3141_v36 }
0x104a   : > { %v3233_v39 = vpop.permute.xlu1 %3232 }
0x104b   : > { %4899 = vpow2.f32 %v3144_v38  ;;  %4645 = vmatpush3.msra.mxu1 %v3233_v39 }
0x104c   : > { %4654 = vmatprep.subr.mxu1 %v5149_v13 }
0x104e   : > { %v3311_v43 = vpop.permute.xlu1 %3310 }
0x1051   : > { %v4898_v24 = vpop.eup %4897 }
0x1052   : > { %v3146_v26 = vsel %vm1157_vm6, %v4898_v24, 0.0  ;;  %v3389_v50 = vpop.permute.xlu1 %3388 }
0x1053   : > { %3147 = vadd.xlane.f32.xlu0 %v3146_v26 }
0x1055   : > { %v4900_v22 = vpop.eup %4899 }
0x1056   : > { %v3149_v40 = vsel %vm1157_vm6, %v4900_v22, 0.0  ;;  %v3387_v54 = vpop.permute.xlu1 %3386 }
0x1057   : > { %3150 = vadd.xlane.f32.xlu0 %v3149_v40 }
0x106d   : > { %3308 = vrot.lane.b32.xlu0 %v5546_v20, %s5157_s17 }
0x10e0   : > { %v3148_v41 = vpop.xlane.xlu0 %3147 }
0x10e1   : > { %4901 = vrcp.f32 %v3148_v41 }
0x10e4   : > { %v3151_v42 = vpop.xlane.xlu0 %3150 }
0x10e5   : > { %4903 = vrcp.f32 %v3151_v42 }
0x10e8   : > { %v3309_v20 = vpop.permute.xlu0 %3308 }
0x10eb   : > { %v4902_v44 = vpop.eup %4901 }
0x10ec   : > { %v3154_v45 = vmul.f32 %v4902_v44, %v4898_v24 }
0x10ee   : > { %4642 = vmatmul.mubr.msk.f32.vlgmr.msra.gmra.mrb[28].mxu0 %vm1157_vm6, %v3154_v45 }
0x10ef   : > { %v4904_v47 = vpop.eup %4903  ;;  %4650 = vmatpush3.xpose.msk.msra.mxu0 %vm1004_vm5, %v3311_v43  ;;  %4651 = vmatprep.mubr.msk.f32.mxu0 %vm5150_vm3, %v5149_v13 }
0x10f0   : > { %v3155_v52 = vmul.f32 %v4904_v47, %v4900_v22  ;;  %4659 = vmatprep.subr.mxu0 %v5149_v13 }
0x10f2   : > { %4647 = vmatmul.mubr.msk.f32.vlgmr.msra.gmra.mrb[36].mxu1 %vm1157_vm6, %v3155_v52  ;;  %4652 = vmatmul.mubr.msk.f32.vlgmr.msra.gmra.mrb[30].mxu0 %vm1004_vm5, %v3309_v20 }
0x10f3   : > { %4655 = vmatpush3.xpose.msk.msra.mxu1 %vm1004_vm5, %v3389_v50  ;;  %4656 = vmatprep.mubr.msk.f32.mxu1 %vm5150_vm3, %v5149_v13 }
0x10f4   : > { %4664 = vmatprep.subr.mxu1 %v5149_v13  ;;  %4661 = vmatprep.mubr.msk.f32.mxu0 %vm5150_vm3, %v5149_v13 }
0x10f6   : > { %4657 = vmatmul.mubr.msk.f32.vlgmr.msra.gmra.mrb[38].mxu1 %vm1004_vm5, %v3387_v54 }
0x10f7   : > { %4666 = vmatprep.mubr.msk.f32.mxu1 %vm5150_vm3, %v5149_v13 }
0x11c1   : > { %v3228_v55 = vpop.f32.mrb[28].mxu0 }
0x11c2   : > { %v4643_v56 = vpop.f32.mrb[29].mxu0 }
0x11c5   : > { %v3304_v57 = vpop.f32.mrb[36].mxu1  ;;  %v3382_v58 = vpop.f32.mrb[30].mxu0 }
0x11c6   : > { %v4825_v59 = vpack.i.bf16 %v3304_v57, %v3228_v55  ;;  %v4648_v61 = vpop.f32.mrb[37].mxu1  ;;  %v4653_v63 = vpop.f32.mrb[31].mxu0  ;;  %v3464_v0 = vsel %vm1157_vm6, %v3382_v58, -inf }
0x11c7   : > { %3465 = vmax.xlane.f32.xlu0 %v3464_v0 }
0x11c9   : > { %v3460_v1 = vpop.f32.mrb[38].mxu1 }
0x11ca   : > { %v4658_v2 = vpop.f32.mrb[39].mxu1  ;;  %v3467_v3 = vsel %vm1157_vm6, %v3460_v1, -inf }
0x11cb   : > { %3468 = vmax.xlane.f32.xlu1 %v3467_v3  ;;  %v4843_v2 = vld [vmem:[%s630_s13] sm:$0xff]   ;;  %v4844_v3 = vld [vmem:[%s630_s13 + $0x8] sm:$0xff]  }
0x11dc   : > { %3562 = vrot.lane.b32.xlu1 %v5588_v48, %s5157_s17 }
0x11e0   : > { %4801 = vrot.lane.b32.xlu1 %v4800_v37, %s5158_s30 }
0x11e4   : > { %4806 = vrot.lane.b32.xlu1 %v4805_v10, %s5159_s16 }
0x11e8   : > { %4816 = vrot.lane.b32.xlu1 %v4815_v32, %s5160_s26 }
0x11ec   : > { %4826 = vrot.lane.b32.xlu1 %v4825_v59, %s5161_s20 }
0x1254   : > { %v3466_v4 = vpop.xlane.xlu0 %3465 }
0x1255   : > { %v3470_v48 = vsub.f32 %v3382_v58, %v3466_v4  ;;  %v4845_v4 = vld [vmem:[%s5506_s6] sm:$0xff]  }
0x1257   : > { %v3472_v5 = vmul.f32 1.442695, %v3470_v48  ;;  %v4846_v48 = vld [vmem:[%s5506_s6 + $0x8] sm:$0xff]  }
0x1258   : > { %v3469_v7 = vpop.xlane.xlu1 %3468 }
0x1259   : > { %4905 = vpow2.f32 %v3472_v5  ;;  %v3471_v33 = vsub.f32 %v3460_v1, %v3469_v7  ;;  %v4917_v7 = vld [vmem:[#allocation9] sm:$0xff] }
0x125b   : > { %v3474_v35 = vmul.f32 1.442695, %v3471_v33 }
0x125c   : > { %v3563_v37 = vpop.permute.xlu1 %3562 }
0x125d   : > { %4907 = vpow2.f32 %v3474_v35  ;;  %4665 = vmatpush3.msra.mxu1 %v3563_v37 }
0x125e   : > { %4677 = vmatprep.subr.bf16.mxu1 %v5149_v13 }
0x1260   : > { %v4802_v19 = vpop.permute.xlu1 %4801 }
0x1261   : > { %v4804_v25 = vunpack.i.h.bf16 %v4802_v19  ;;  %v4803_v27 = vunpack.i.l.bf16 %v4802_v19 }
0x1263   : > { %v4906_v6 = vpop.eup %4905  ;;  %v3695_v24 = vsel %vm1004_vm5, %v5613_v62, %v4804_v25  ;;  %v3694_v26 = vsel %vm1004_vm5, %v5611_v60, %v4803_v27 }
0x1264   : > { %v3476_v8 = vsel %vm1157_vm6, %v4906_v6, 0.0  ;;  %v4807_v21 = vpop.permute.xlu1 %4806 }
0x1265   : > { %3477 = vadd.xlane.f32.xlu0 %v3476_v8  ;;  %v4809_v29 = vunpack.i.h.bf16 %v4807_v21  ;;  %v4808_v31 = vunpack.i.l.bf16 %v4807_v21 }
0x1267   : > { %v4908_v10 = vpop.eup %4907  ;;  %v3696_v22 = vsel %vm1157_vm6, %v3694_v26, %v4808_v31  ;;  %v3697_v40 = vsel %vm1157_vm6, %v3695_v24, %v4809_v29  ;;  %v4366_v24 = vld [vmem:[%s6091_s4] ss:$0 sm:$0xff] }
0x1268   : > { %v3479_v28 = vsel %vm1157_vm6, %v4908_v10, 0.0  ;;  %v4817_v34 = vpop.permute.xlu1 %4816 }
0x1269   : > { %3480 = vadd.xlane.f32.xlu0 %v3479_v28  ;;  %v4819_v45 = vunpack.i.h.bf16 %v4817_v34  ;;  %v4818_v47 = vunpack.i.l.bf16 %v4817_v34 }
0x126c   : > { %v4827_v50 = vpop.permute.xlu1 %4826 }
0x126d   : > { %v4829_v60 = vunpack.i.h.bf16 %v4827_v50  ;;  %v4828_v55 = vunpack.i.l.bf16 %v4827_v50  ;;  %v4848_v50 = vld [vmem:[%s5506_s6 + $0x18] sm:$0xff]  }
0x127f   : > { %3486 = vrot.lane.b32.xlu0 %v5585_v46, %s5157_s17 }
0x1283   : > { %4811 = vrot.lane.b32.xlu0 %v4810_v53, %s5162_s11  ;;  %v4841_v53 = vld [vmem:[%s6089_s15] sm:$0xff]  }
0x1287   : > { %4821 = vrot.lane.b32.xlu0 %v4820_v15, %s5163_s21 }
0x12f2   : > { %v3478_v30 = vpop.xlane.xlu0 %3477 }
0x12f3   : > { %4909 = vrcp.f32 %v3478_v30 }
0x12f6   : > { %v3481_v32 = vpop.xlane.xlu0 %3480 }
0x12f7   : > { %4911 = vrcp.f32 %v3481_v32 }
0x12fa   : > { %v3487_v11 = vpop.permute.xlu0 %3486 }
0x12fb   : > { %4660 = vmatpush3.msra.mxu0 %v3487_v11 }
0x12fc   : > { %4669 = vmatprep.subr.bf16.mxu0 %v5149_v13 }
0x12fd   : > { %v4910_v46 = vpop.eup %4909 }
0x12fe   : > { %v3484_v14 = vmul.f32 %v4910_v46, %v4906_v6  ;;  %v4812_v23 = vpop.permute.xlu0 %4811  ;;  %v4918_v6 = vld [vmem:[#allocation9 + $0x8] sm:$0xff] }
0x12ff   : > { %v4814_v36 = vunpack.i.h.bf16 %v4812_v23  ;;  %v4813_v38 = vunpack.i.l.bf16 %v4812_v23 }
0x1300   : > { %4662 = vmatmul.mubr.msk.f32.vlgmr.msra.gmra.mrb[32].mxu0 %vm1157_vm6, %v3484_v14 }
0x1301   : > { %v4912_v49 = vpop.eup %4911  ;;  %4673 = vmatprep.mubr.msk.bf16.mxu0 %vm5150_vm3, %v5149_v13  ;;  %4670 = vmatpush3.bf16.msra.mxu0 %v4841_v53  ;;  %v3699_v41 = vsel %vm3698_vm7, %v3696_v22, %v4813_v38  ;;  %v3700_v42 = vsel %vm3698_vm7, %v3697_v40, %v4814_v36  ;;  %v4367_v40 = vld [vmem:[%s6092_s0] ss:$0 sm:$0xff] }
0x1302   : > { %v3485_v51 = vmul.f32 %v4912_v49, %v4908_v10  ;;  %4671 = vmatprep.subr.bf16.mxu0 %v5149_v13  ;;  %v4822_v39 = vpop.permute.xlu0 %4821  ;;  %v3702_v52 = vsel %vm3701_vm8, %v3699_v41, %v4818_v47  ;;  %v3703_v20 = vsel %vm3701_vm8, %v3700_v42, %v4819_v45  ;;  %v4847_v47 = vld [vmem:[%s5506_s6 + $0x10] sm:$0xff]  }
0x1303   : > { %v4824_v43 = vunpack.i.h.bf16 %v4822_v39  ;;  %v4823_v44 = vunpack.i.l.bf16 %v4822_v39 }
0x1304   : > { %4667 = vmatmul.mubr.msk.f32.vlgmr.msra.gmra.mrb[40].mxu1 %vm1157_vm6, %v3485_v51 }
0x1305   : > { %4681 = vmatprep.mubr.msk.bf16.mxu1 %vm5150_vm3, %v5149_v13  ;;  %4672 = vmatpush3.bf16.msra.mxu0 %v4842_v9  ;;  %v3705_v54 = vsel %vm3704_vm9, %v3702_v52, %v4823_v44  ;;  %v3706_v62 = vsel %vm3704_vm9, %v3703_v20, %v4824_v43  ;;  %v4368_v52 = vld [vmem:[%s740_s24] ss:$0 sm:$0xff] }
0x1306   : > { %4685 = vmatprep.subr.bf16.mxu0 %v5149_v13  ;;  %v3708_v59 = vsel %vm3707_vm10, %v3705_v54, %v4828_v55  ;;  %v3709_v61 = vsel %vm3707_vm10, %v3706_v62, %v4829_v60  ;;  %4678 = vmatpush3.bf16.msra.mxu1 %v4843_v2 }
0x1307   : > { %4679 = vmatprep.subr.bf16.mxu1 %v5149_v13 }
0x130a   : > { %4680 = vmatpush3.bf16.msra.mxu1 %v4844_v3 }
0x13d3   : > { %v3558_v12 = vpop.f32.mrb[32].mxu0 }
0x13d4   : > { %v4663_v15 = vpop.f32.mrb[33].mxu0 }
0x13d7   : > { %v3634_v16 = vpop.f32.mrb[40].mxu1 }
0x13d8   : > { %v4830_v17 = vpack.i.bf16 %v3634_v16, %v3558_v12  ;;  %v4668_v18 = vpop.f32.mrb[41].mxu1 }
0x13da   : > { %4831 = vrot.lane.b32.xlu0 %v4830_v17, %s5164_s3 }
0x144c   : > { %v4832_v56 = vpop.permute.xlu0 %4831 }
0x144d   : > { %v4834_v57 = vunpack.i.h.bf16 %v4832_v56  ;;  %v4833_v58 = vunpack.i.l.bf16 %v4832_v56 }
0x144f   : > { %v3712_v63 = vsel %vm3710_vm11, %v3709_v61, %v4834_v57  ;;  %v3711_v0 = vsel %vm3710_vm11, %v3708_v59, %v4833_v58 }
0x1450   : > { %v3713_v1 = vpack.c.bf16 %v3712_v63, %v3711_v0 }
0x1452   : > { %4674 = vmatmul.mubr.msk.bf16.vlgmr.msra.gmra.mrb[36].mxu0 %vm845_vm4, %v3713_v1 }
0x1453   : > { %4693 = vmatprep.mubr.msk.bf16.mxu0 %vm5150_vm3, %v5149_v13  ;;  %4686 = vmatpush3.bf16.msra.mxu0 %v4845_v4 }
0x1454   : > { %4687 = vmatprep.subr.bf16.mxu0 %v5149_v13 }
0x1457   : > { %4688 = vmatpush3.bf16.msra.mxu0 %v4846_v48 }
0x1458   : > { %4689 = vmatprep.subr.bf16.mxu0 %v5149_v13 }
0x145b   : > { %4690 = vmatpush3.bf16.msra.mxu0 %v4847_v47 }
0x145c   : > { %4691 = vmatprep.subr.bf16.mxu0 %v5149_v13  ;;  %v4372_v13 = vld [vmem:[%s748_s18] ss:$0 sm:$0xff] }
0x145f   : > { %4692 = vmatpush3.bf16.msra.mxu0 %v4848_v50 }
0x1525   : > { %v3767_v5 = vpop.f32.mrb[36].mxu0 }
0x1526   : > { %v3774_v33 = vadd.f32 %v4917_v7, %v3767_v5  ;;  %v4675_v35 = vpop.f32.mrb[37].mxu0 }
0x1527   : > { %v3770_v37 = vpop.f32.mrb[38].mxu0 }
0x1528   : > { %v3775_v8 = vadd.f32 %v4918_v6, %v3770_v37  ;;  %v4676_v10 = vpop.f32.mrb[39].mxu0  ;;  %v3776_v28 = vsel %vm845_vm4, %v3774_v33, 0.0 }
0x152a   : > { %v3777_v30 = vsel %vm845_vm4, %v3775_v8, 0.0 }
0x152b   : > { %v3778_v32 = vadd.f32 %v3777_v30, %v3776_v28 }
0x152d   : > { %v3779_v11 = vrot.slane %v3778_v32, 4 }
0x152f   : > { %v3780_v46 = vadd.f32 %v3779_v11, %v3778_v32 }
0x1531   : > { %v3781_v14 = vrot.slane %v3780_v46, 2 }
0x1533   : > { %v3782_v49 = vadd.f32 %v3781_v14, %v3780_v46 }
0x1535   : > { %v3783_v51 = vrot.slane %v3782_v49, 1 }
0x1537   : > { %v3784_v53 = vadd.f32 %v3783_v51, %v3782_v49 }
0x1539   : > { %v3786_v9 = vmul.f32 0.0625, %v3784_v53 }
0x153b   : > { %v3787_v12 = vsub.f32 %v3774_v33, %v3786_v9  ;;  %v3788_v15 = vsub.f32 %v3775_v8, %v3786_v9 }
0x153d   : > { %v3789_v16 = vmul.f32 %v3787_v12, %v3787_v12  ;;  %v3790_v17 = vmul.f32 %v3788_v15, %v3788_v15 }
0x153f   : > { %v3791_v18 = vsel %vm845_vm4, %v3789_v16, 0.0  ;;  %v3792_v19 = vsel %vm845_vm4, %v3790_v17, 0.0 }
0x1540   : > { %v3793_v21 = vadd.f32 %v3792_v19, %v3791_v18 }
0x1542   : > { %v3794_v23 = vrot.slane %v3793_v21, 4 }
0x1544   : > { %v3795_v25 = vadd.f32 %v3794_v23, %v3793_v21 }
0x1546   : > { %v3796_v27 = vrot.slane %v3795_v25, 2 }
0x1548   : > { %v3797_v29 = vadd.f32 %v3796_v27, %v3795_v25  ;;  %v4378_v25 = vld [vmem:[%s751_s9] ss:$0 sm:$0xff] }
0x154a   : > { %v3798_v31 = vrot.slane %v3797_v29, 1 }
0x154c   : > { %v3799_v34 = vadd.f32 %v3798_v31, %v3797_v29  ;;  %v4379_v31 = vld [vmem:[%s754_s29] ss:$0 sm:$0xff] }
0x154e   : > { %v3800_v36 = vmul.f32 0.0625, %v3799_v34 }
0x1550   : > { %v3801_v38 = vadd.f32 1e-05, %v3800_v36 }
0x1552   : > { %4913 = vrsqrt.f32 %v3801_v38 }
0x155c   : > { %v4914_v39 = vpop.eup %4913 }
0x155d   : > { %v3803_v26 = vmul.f32 %v4914_v39, %v3787_v12  ;;  %v3804_v22 = vmul.f32 %v4914_v39, %v3788_v15 }
0x155f   : > { %v3812_v41 = vmul.f32 %v4366_v24, %v3803_v26  ;;  %v3813_v42 = vmul.f32 %v4366_v24, %v3804_v22 }
0x1561   : > { %v3821_v43 = vadd.f32 %v4367_v40, %v3812_v41  ;;  %v3822_v44 = vadd.f32 %v4367_v40, %v3813_v42 }
0x1563   : > { %v3823_v45 = vpack.c.bf16 %v3822_v44, %v3821_v43 }
0x1565   : > { %4682 = vmatmul.mubr.msk.bf16.vlgmr.msra.gmra.mrb[44].mxu1 %vm845_vm4, %v3823_v45 }
0x1638   : > { %v3884_v20 = vpop.f32.mrb[44].mxu1 }
0x1639   : > { %v3885_v54 = vadd.f32 %v4368_v52, %v3884_v20  ;;  %v4683_v62 = vpop.f32.mrb[45].mxu1 }
0x163a   : > { %v3887_v60 = vpop.f32.mrb[46].mxu1 }
0x163b   : > { %v3888_v55 = vadd.f32 %v4368_v52, %v3887_v60  ;;  %v4684_v56 = vpop.f32.mrb[47].mxu1  ;;  %v3891_v57 = vmax.f32 %v3885_v54, 0.0 }
0x163d   : > { %v3892_v58 = vmax.f32 %v3888_v55, 0.0 }
0x163f   : > { %v3893_v59 = vpack.c.bf16 %v3892_v58, %v3891_v57 }
0x1641   : > { %4694 = vmatmul.mubr.msk.bf16.vlgmr.msra.gmra.mrb[40].mxu0 %vm3933_vm12, %v3893_v59 }
0x1714   : > { %v3971_v61 = vpop.f32.mrb[40].mxu0 }
0x1715   : > { %v3972_v63 = vadd.f32 %v4372_v13, %v3971_v61  ;;  %v4695_v0 = vpop.f32.mrb[41].mxu0 }
0x1716   : > { %v3974_v1 = vpop.f32.mrb[42].mxu0 }
0x1717   : > { %v3978_v2 = vadd.f32 %v3972_v63, %v3821_v43  ;;  %v3975_v3 = vadd.f32 %v4372_v13, %v3974_v1  ;;  %v4696_v4 = vpop.f32.mrb[43].mxu0 }
0x1719   : > { %v3979_v48 = vadd.f32 %v3975_v3, %v3822_v44  ;;  %v3980_v5 = vsel %vm845_vm4, %v3978_v2, 0.0 }
0x171b   : > { %v3981_v7 = vsel %vm845_vm4, %v3979_v48, 0.0 }
0x171c   : > { %v3982_v33 = vadd.f32 %v3981_v7, %v3980_v5 }
0x171e   : > { %v3983_v35 = vrot.slane %v3982_v33, 4 }
0x1720   : > { %v3984_v37 = vadd.f32 %v3983_v35, %v3982_v33 }
0x1722   : > { %v3985_v6 = vrot.slane %v3984_v37, 2 }
0x1724   : > { %v3986_v8 = vadd.f32 %v3985_v6, %v3984_v37 }
0x1726   : > { %v3987_v10 = vrot.slane %v3986_v8, 1 }
0x1728   : > { %v3988_v28 = vadd.f32 %v3987_v10, %v3986_v8 }
0x172a   : > { %v3989_v30 = vmul.f32 0.0625, %v3988_v28 }
0x172c   : > { %v3990_v32 = vsub.f32 %v3978_v2, %v3989_v30  ;;  %v3991_v11 = vsub.f32 %v3979_v48, %v3989_v30 }
0x172e   : > { %v3992_v46 = vmul.f32 %v3990_v32, %v3990_v32  ;;  %v3993_v14 = vmul.f32 %v3991_v11, %v3991_v11 }
0x1730   : > { %v3994_v49 = vsel %vm845_vm4, %v3992_v46, 0.0  ;;  %v3995_v51 = vsel %vm845_vm4, %v3993_v14, 0.0 }
0x1731   : > { %v3996_v53 = vadd.f32 %v3995_v51, %v3994_v49 }
0x1733   : > { %v3997_v9 = vrot.slane %v3996_v53, 4 }
0x1735   : > { %v3998_v12 = vadd.f32 %v3997_v9, %v3996_v53 }
0x1737   : > { %v3999_v15 = vrot.slane %v3998_v12, 2 }
0x1739   : > { %v4000_v16 = vadd.f32 %v3999_v15, %v3998_v12 }
0x173b   : > { %v4001_v17 = vrot.slane %v4000_v16, 1 }
0x173d   : > { %v4002_v18 = vadd.f32 %v4001_v17, %v4000_v16 }
0x173f   : > { %v4003_v19 = vmul.f32 0.0625, %v4002_v18 }
0x1741   : > { %v4004_v21 = vadd.f32 1e-05, %v4003_v19 }
0x1743   : > { %4915 = vrsqrt.f32 %v4004_v21 }
0x174d   : > { %v4916_v23 = vpop.eup %4915 }
0x174e   : > { %v4006_v27 = vmul.f32 %v4916_v23, %v3990_v32  ;;  %v4007_v29 = vmul.f32 %v4916_v23, %v3991_v11  ;;  %4031 = sbr.rel (%p4380_p0) target bundleno = 5989 (0x1765), region = 104 }
0x1750   : > { %v4015_v34 = vmul.f32 %v4378_v25, %v4006_v27  ;;  %v4016_v36 = vmul.f32 %v4378_v25, %v4007_v29 }
0x1752   : > { %v4024_v38 = vadd.f32 %v4379_v31, %v4015_v34  ;;  %v4025_v39 = vadd.f32 %v4379_v31, %v4016_v36 }
0x1754   : > { %4026 = vst.msk [vmem:[#allocation9] sm:$0xff] %vm845_vm4, %v4024_v38  ;;  %4027 = vst.msk [vmem:[#allocation9 + $0x8] sm:$0xff] %vm845_vm4, %v4025_v39  ;;  %v4032_v24 = vsel (!%p4380_p0), %vm845_vm4, %v4024_v38, 0.0  ;;  %v4039_v26 = vsel (!%p4380_p0), %vm845_vm4, %v4025_v39, 0.0 }
0x1755   : > { %v4033_v22 = vrot.slane %v4032_v24, 4  ;;  %v4040_v40 = vrot.slane %v4039_v26, 4 }
0x1757   : > { %v4034_v41 = vadd.f32 %v4033_v22, %v4032_v24  ;;  %v4041_v42 = vadd.f32 %v4040_v40, %v4039_v26 }
0x1759   : > { %v4035_v43 = vrot.slane %v4034_v41, 2  ;;  %v4042_v44 = vrot.slane %v4041_v42, 2 }
0x175b   : > { %v4036_v45 = vadd.f32 %v4035_v43, %v4034_v41  ;;  %v4043_v47 = vadd.f32 %v4042_v44, %v4041_v42 }
0x175d   : > { %v4037_v50 = vrot.slane %v4036_v45, 1  ;;  %v4044_v52 = vrot.slane %v4043_v47, 1 }
0x175f   : > { %v4038_v20 = vadd.f32 %v4037_v50, %v4036_v45  ;;  %v4045_v54 = vadd.f32 %v4044_v52, %v4043_v47 }
0x1761   : > { %v4047_v62 = vmul.f32 0.125, %v4038_v20  ;;  %v4048_v60 = vmul.f32 0.125, %v4045_v54 }
0x1763   : > { %v4052_v55 = vsel %vm4051_vm13, %v4048_v60, %v4047_v62 }
0x1764   : > { %4055 = vst.msk [vmem:[#allocation10] sm:$0x3] %vm4054_vm14, %v4052_v55 }
0x1765 PF: > { %p4736_p8 = scmp.eq.s32.totalorder %s5272_s25, 1  ;;  %s5165_s9 = smov [#allocation9]  }
0x1766   : > { %s4062_s29 = sshll.u32 %s5165_s9, 4  ;;  %s4063_s29 = int_to_ptr.vmem [resolvable:$true] %s4062_s29 }
0x1767   : > { %s5035_s19 = scalar_lea.vmem %s4063_s29, 256  ;;  %p5042_p11 = scmp.lt.s32.totalorder %s4063_s29, %s4063_s29 }
0x1768   : > { %p5036_p2 = scmp.ne.s32.totalorder %s4063_s29, %s5035_s19  ;;  %p5043_p12 = scmp.lt.s32.totalorder %s5035_s19, %s5035_s19 }
0x176a   : > { %p5037_p4 = pnand %p5036_p2, %p4736_p8  ;;  %p5044_p13 = por %p5043_p12, %p5042_p11 }
0x176c   : > { %p5038_p7 = pneg %p5037_p4 }
0x176e   : > { %p5045_p5 = pnand %p5044_p13, %p5038_p7 }
0x1770   : > { %5048 = shalt.err (!%p5045_p5)
}
0x1771   : > { %s6096_s1 = sld [smem:[#allocation31_spill]] }
0x1777   : > { %s5049_s3 = scalar_lea.hbm %s6096_s1, 256 }
0x1778   : > { %p5050_p10 = scmp.ne.s32.totalorder %s6096_s1, %s5049_s3  ;;  %p5055_p3 = scmp.lt.u32.totalorder %s5049_s3, %s6096_s1 }
0x177a   : > { %p5051_p1 = pnand %p5050_p10, %p4736_p8 }
0x177c   : > { %p5052_p9 = pneg %p5051_p1 }
0x177e   : > { %p5057_p6 = pnand %p5055_p3, %p5052_p9 }
0x1780   : > { %5060 = shalt.err (!%p5057_p6)
}
0x1781   : > { %s5166_s14 = smov 128   ;;  %s5167_s2 = smov [#allocation10]  }
0x1782   : > { %4710 = dma.vmem_to_hbm [thread:$0]  (%p4736_p8), %s4063_s29, 256, %s6096_s1, [#allocation4], %s5166_s14, %s5166_s14, %s5159_s16  }
0x1783   : > { %s4076_s28 = sshll.u32 %s5167_s2, 4  ;;  %s4077_s28 = int_to_ptr.vmem [resolvable:$true] %s4076_s28 }
0x1784   : > { %s5061_s17 = scalar_lea.vmem %s4077_s28, 32  ;;  %p5068_p7 = scmp.lt.s32.totalorder %s4077_s28, %s4077_s28 }
0x1785   : > { %p5062_p0 = scmp.ne.s32.totalorder %s4077_s28, %s5061_s17  ;;  %p5069_p11 = scmp.lt.s32.totalorder %s5061_s17, %s5061_s17 }
0x1787   : > { %p5063_p2 = pnand %p5062_p0, %p4736_p8  ;;  %p5070_p12 = por %p5069_p11, %p5068_p7 }
0x1789   : > { %p5064_p4 = pneg %p5063_p2 }
0x178b   : > { %p5071_p13 = pnand %p5070_p12, %p5064_p4 }
0x178d   : > { %5074 = shalt.err (!%p5071_p13)
}
0x178e   : > { %s6097_s18 = sld [smem:[#allocation32_spill]] }
0x1794   : > { %s5075_s30 = scalar_lea.hbm %s6097_s18, 32 }
0x1795   : > { %p5076_p5 = scmp.ne.s32.totalorder %s6097_s18, %s5075_s30  ;;  %p5081_p9 = scmp.lt.u32.totalorder %s5075_s30, %s6097_s18 }
0x1797   : > { %p5077_p10 = pnand %p5076_p5, %p4736_p8 }
0x1799   : > { %p5078_p1 = pneg %p5077_p10 }
0x179b   : > { %p5083_p3 = pnand %p5081_p9, %p5078_p1 }
0x179d   : > { %5086 = shalt.err (!%p5083_p3)
}
0x179e   : > { %4712 = dma.vmem_to_hbm [thread:$0]  (%p4736_p8), %s4077_s28, 32, %s6097_s18, [#allocation11]  }
0x179f   : > { %5116 = dma.done.wait (%p4736_p8), [#allocation4], 256  }
0x17a0   : > { %5118 = vsyncadd (%p4736_p8), [#allocation4], 4294967040 }
0x17a1   : > { %5120 = dma.done.wait (%p4736_p8), [#allocation11], 32  }
0x17a2   : > { %5122 = vsyncadd (%p4736_p8), [#allocation11], 4294967264 }
0x17a3 PF: > { %s6098_s24 = sld [smem:[#allocation17_spill]]  ;;  %s6099_s19 = sld [smem:[#allocation18_spill]] }
0x17a4   : > { %s6100_s21 = smov %s5129_s22  ;;  %s6101_s22 = smov %s5133_s23 }
0x17a9   : > { %p28_p6 = scmp.ge.s32.totalorder %s6098_s24, 4   ;;  %s6102_s23 = smov %s6099_s19 }
0x17ab   :  { %30 = sbr.rel (!%p28_p6) target bundleno = 20 (0x14), region = 181 }
0x17b2   :  { %4093 = vsyncpa [#allocation3], 1 }
0x17b3   :  { %4095 = vsyncpa [#allocation3 + $0x1], 1 }
0x17b4   :  { %4096 = vsyncpa [#allocation6], 1 }
0x17b5   :  { %4097 = vsyncpa [#allocation4], 1 }
0x17b6   :  { %4099 = vsyncpa [#allocation4 + $0x1], 1 }
0x17b7   :  { %4100 = vsyncpa [#allocation11], 1 }

</bundles_post_ra>
